<compile_context>
chip_gen: v7x
topology: tpu7x:2x2x1
jax: 0.10.0
libtpu: 0.0.40
codegen_flags: <defaults>
</compile_context>

<pallas_src>
import functools

import jax
import jax.numpy as jnp
from jax import lax
from jax.experimental import pallas as pl
from jax.experimental.pallas import tpu as pltpu


# ------------------------------ Pallas kernel -------------------------------

def _full_spec(shape):
    # single block == full array (legal even when not (8,128)-aligned)
    return pl.BlockSpec(shape, lambda: (0,) * len(shape))


def _make_fused_kernel(B, H, Cin, Ho, Wo, Cout, KS, NCLS):
    HW = Ho * Wo  # flattened spatial size of the conv output

    def kernel(xe_ref, xo_ref, w_ref, shift_ref, wl_ref, lb_ref,
               o_ref, patch_sc, conv_sc):
        # ---------- in-kernel im2col: fill patch_sc (B*HW, KS*KS*Cin) ----------
        # patch column order is (kh, kw, ci); the conv weight is pre-permuted to
        # match, so every write below is a contiguous (Wo, Cin) tile.
        for b in range(B):
            for ho in range(Ho):
                row0 = b * HW + ho * Wo
                for kh in range(KS):
                    r = b * H + 2 * ho + kh          # input row (stride 2 in H)
                    even = xe_ref[r]                 # (ceil(W/2), Cin) = W cols 0,2,4,...
                    odd = xo_ref[r]                  # (floor(W/2), Cin) = W cols 1,3,5,...
                    for kw in range(KS):
                        if kw == 0:
                            tile = even[0:Wo, :]     # W = 2*wo
                        elif kw == 1:
                            tile = odd[0:Wo, :]      # W = 2*wo + 1
                        else:
                            tile = even[1:1 + Wo, :]  # W = 2*wo + 2
                        col0 = (kh * KS + kw) * Cin
                        patch_sc[row0:row0 + Wo, col0:col0 + Cin] = tile

        # ---------- conv as one MXU matmul, fused BN shift + ReLU ----------
        # BN scale already folded into w_ref; shift = beta - mean*scale.
        conv_sc[...] = jnp.maximum(
            jnp.dot(patch_sc[...], w_ref[...],
                    preferred_element_type=jnp.float32) + shift_ref[...],
            0.0)                                      # (B*HW, Cout), stays in VMEM

        # ---------- Linear head, directly from the VMEM-resident activation ----
        # wl_ref is the Linear weight pre-permuted to (n, hw, c), so
        # out[b, n] = sum_{hw,c} conv[b*HW+hw, c] * wl[n, hw, c] + bias[n]
        # — no flatten / transpose / reshape anywhere.
        for b in range(B):
            cb = conv_sc[b * HW:(b + 1) * HW, :]      # (HW, Cout)
            for n in range(NCLS):
                prod = cb * wl_ref[n]                 # (HW, Cout) VPU multiply
                s = jnp.sum(jnp.sum(prod, axis=1, keepdims=True),
                            axis=0, keepdims=True)    # (1, 1)
                o_ref[b:b + 1, n:n + 1] = s + lb_ref[:, n:n + 1]

    return kernel


# --------------------------------- Wrapper ----------------------------------

@jax.jit
def server_conv2d_forward(x, params):
    B, Cin, H, W = x.shape
    KS, S = 3, 2
    Ho = (H - KS) // S + 1
    Wo = (W - KS) // S + 1
    Cout = params["conv_w"].shape[0]
    NCLS = params["lin_w"].shape[0]
    HW = Ho * Wo
    M = B * HW
    KD = KS * KS * Cin

    # ---- layout plumbing (tiny, fused by XLA under jit) ----
    # NHWC so Cin sits on lanes; even/odd split along W handles the stride-2
    # sampling once, so the kernel never needs strided loads.
    x_nhwc = jnp.transpose(x, (0, 2, 3, 1))                     # (B, H, W, Cin)
    xe = x_nhwc[:, :, 0::2, :].reshape(B * H, -1, Cin)          # (B*H, ceil(W/2), Cin)
    xo = x_nhwc[:, :, 1::2, :].reshape(B * H, -1, Cin)          # (B*H, floor(W/2), Cin)

    # ---- fold BatchNorm (eval mode) into the conv weight ----
    eps = 1e-5
    scale = params["bn_gamma"] * lax.rsqrt(params["bn_var"] + eps)        # (Cout,)
    shift = (params["bn_beta"] - params["bn_mean"] * scale).reshape(1, Cout)
    # conv weight -> (kh, kw, ci, co) to match the patch column order, scaled.
    w2s = (params["conv_w"].transpose(2, 3, 1, 0).reshape(KD, Cout)
           * scale.reshape(1, Cout))

    # ---- pre-permute the Linear weight: PyTorch row index c*HW + hw -> (hw, c)
    wl = params["lin_w"].reshape(NCLS, Cout, HW).transpose(0, 2, 1)       # (N, HW, Cout)
    lb = params["lin_b"].reshape(1, NCLS)

    kernel = _make_fused_kernel(B, H, Cin, Ho, Wo, Cout, KS, NCLS)
    return pl.pallas_call(
        kernel,
        out_shape=jax.ShapeDtypeStruct((B, NCLS), jnp.float32),
        in_specs=[_full_spec(xe.shape), _full_spec(xo.shape),
                  _full_spec((KD, Cout)), _full_spec((1, Cout)),
                  _full_spec((NCLS, HW, Cout)), _full_spec((1, NCLS))],
        out_specs=_full_spec((B, NCLS)),
        scratch_shapes=[pltpu.VMEM((M, KD), jnp.float32),    # im2col patches
                        pltpu.VMEM((M, Cout), jnp.float32)],  # conv activation
    )(xe, xo, w2s, shift, wl, lb)


# ----------------------------- Pure-JAX reference ---------------------------

def reference_forward(x, params):
    y = lax.conv_general_dilated(
        x, params["conv_w"], window_strides=(2, 2), padding="VALID",
        dimension_numbers=("NCHW", "OIHW", "NCHW"),
        precision=lax.Precision.HIGHEST)
    eps = 1e-5
    g = params["bn_gamma"].reshape(1, -1, 1, 1)
    b = params["bn_beta"].reshape(1, -1, 1, 1)
    m = params["bn_mean"].reshape(1, -1, 1, 1)
    v = params["bn_var"].reshape(1, -1, 1, 1)
    y = (y - m) / jnp.sqrt(v + eps) * g + b
    y = jnp.maximum(y, 0.0).reshape(y.shape[0], -1)             # Flatten(1)
    return (jnp.matmul(y, params["lin_w"].T, precision=lax.Precision.HIGHEST)
            + params["lin_b"])


# ----------------------------------- Main ------------------------------------

if __name__ == "__main__":
    # Shapes implied by the module: Conv2d(8->16, k=3, s=2) and the hardcoded
    # Linear input of 352 = 16 * 2 * 11  =>  spatial input (5, 23).
    B, Cin, H, W = 2, 8, 5, 23
    num_class = 3

    key = jax.random.PRNGKey(0)
    k_x, k_cw, k_g, k_b, k_m, k_v, k_lw, k_lb = jax.random.split(key, 8)

    x = jax.random.normal(k_x, (B, Cin, H, W), dtype=jnp.float32)
    params = {
        "conv_w": 0.1 * jax.random.normal(k_cw, (16, Cin, 3, 3), jnp.float32),
        "bn_gamma": 1.0 + 0.1 * jax.random.normal(k_g, (16,), jnp.float32),
        "bn_beta": 0.1 * jax.random.normal(k_b, (16,), jnp.float32),
        "bn_mean": 0.1 * jax.random.normal(k_m, (16,), jnp.float32),
        "bn_var": 1.0 + 0.1 * jnp.abs(jax.random.normal(k_v, (16,), jnp.float32)),
        "lin_w": 0.1 * jax.random.normal(k_lw, (num_class, 352), jnp.float32),
        "lin_b": 0.1 * jax.random.normal(k_lb, (num_class,), jnp.float32),
    }

    out = jax.block_until_ready(server_conv2d_forward(x, params))
    assert out.shape == (B, num_class), out.shape

    # numerical sanity check against a pure-JAX reference (eval-mode BatchNorm)
    ref = jax.block_until_ready(reference_forward(x, params))
    assert bool(jnp.allclose(out, ref, rtol=3e-2, atol=3e-2)), (out, ref)

    print("KERNEL_OK")
</pallas_src>

<mosaic_0001>
module attributes {stable_mosaic.version = 11 : i64} {
  func.func @kernel(%arg0: memref<10x12x8xf32, #tpu.memory_space<vmem>>, %arg1: memref<10x11x8xf32, #tpu.memory_space<vmem>>, %arg2: memref<72x16xf32, #tpu.memory_space<vmem>>, %arg3: memref<1x16xf32, #tpu.memory_space<vmem>>, %arg4: memref<3x22x16xf32, #tpu.memory_space<vmem>>, %arg5: memref<1x3xf32, #tpu.memory_space<vmem>>, %arg6: memref<2x3xf32, #tpu.memory_space<vmem>>, %arg7: memref<44x72xf32, #tpu.memory_space<vmem>>, %arg8: memref<44x16xf32, #tpu.memory_space<vmem>>) attributes {dimension_semantics = [], scalar_prefetch = 0 : i64, scratch_operands = 2 : i64, tpu.core_type = #tpu.core_type<tc>} {
    %c0 = arith.constant 0 : index
    %c0_0 = arith.constant 0 : index
    %c0_1 = arith.constant 0 : index
    %0 = vector.load %arg0[%c0, %c0_0, %c0_1] : memref<10x12x8xf32, #tpu.memory_space<vmem>>, vector<1x12x8xf32>
    %1 = vector.shape_cast %0 : vector<1x12x8xf32> to vector<12x8xf32>
    %c0_2 = arith.constant 0 : index
    %c0_3 = arith.constant 0 : index
    %c0_4 = arith.constant 0 : index
    %2 = vector.load %arg1[%c0_2, %c0_3, %c0_4] : memref<10x11x8xf32, #tpu.memory_space<vmem>>, vector<1x11x8xf32>
    %3 = vector.shape_cast %2 : vector<1x11x8xf32> to vector<11x8xf32>
    %4 = vector.extract_strided_slice %1 {offsets = [0, 0], sizes = [11, 8], strides = [1, 1]} : vector<12x8xf32> to vector<11x8xf32>
    %c0_5 = arith.constant 0 : index
    %c0_6 = arith.constant 0 : index
    %5 = vector.load %arg7[%c0_5, %c0_6] : memref<44x72xf32, #tpu.memory_space<vmem>>, vector<11x8xf32>
    tpu.vector_store %arg7[%c0_5, %c0_6], %4 {strides = array<i32>} : memref<44x72xf32, #tpu.memory_space<vmem>>, vector<11x8xf32>,
    %c0_7 = arith.constant 0 : index
    %c8 = arith.constant 8 : index
    %6 = vector.load %arg7[%c0_7, %c8] : memref<44x72xf32, #tpu.memory_space<vmem>>, vector<11x8xf32>
    tpu.vector_store %arg7[%c0_7, %c8], %3 {strides = array<i32>} : memref<44x72xf32, #tpu.memory_space<vmem>>, vector<11x8xf32>,
    %7 = vector.extract_strided_slice %1 {offsets = [1, 0], sizes = [11, 8], strides = [1, 1]} : vector<12x8xf32> to vector<11x8xf32>
    %c0_8 = arith.constant 0 : index
    %c16 = arith.constant 16 : index
    %8 = vector.load %arg7[%c0_8, %c16] : memref<44x72xf32, #tpu.memory_space<vmem>>, vector<11x8xf32>
    tpu.vector_store %arg7[%c0_8, %c16], %7 {strides = array<i32>} : memref<44x72xf32, #tpu.memory_space<vmem>>, vector<11x8xf32>,
    %c1 = arith.constant 1 : index
    %c0_9 = arith.constant 0 : index
    %c0_10 = arith.constant 0 : index
    %9 = vector.load %arg0[%c1, %c0_9, %c0_10] : memref<10x12x8xf32, #tpu.memory_space<vmem>>, vector<1x12x8xf32>
    %10 = vector.shape_cast %9 : vector<1x12x8xf32> to vector<12x8xf32>
    %c1_11 = arith.constant 1 : index
    %c0_12 = arith.constant 0 : index
    %c0_13 = arith.constant 0 : index
    %11 = vector.load %arg1[%c1_11, %c0_12, %c0_13] : memref<10x11x8xf32, #tpu.memory_space<vmem>>, vector<1x11x8xf32>
    %12 = vector.shape_cast %11 : vector<1x11x8xf32> to vector<11x8xf32>
    %13 = vector.extract_strided_slice %10 {offsets = [0, 0], sizes = [11, 8], strides = [1, 1]} : vector<12x8xf32> to vector<11x8xf32>
    %c0_14 = arith.constant 0 : index
    %c24 = arith.constant 24 : index
    %14 = vector.load %arg7[%c0_14, %c24] : memref<44x72xf32, #tpu.memory_space<vmem>>, vector<11x8xf32>
    tpu.vector_store %arg7[%c0_14, %c24], %13 {strides = array<i32>} : memref<44x72xf32, #tpu.memory_space<vmem>>, vector<11x8xf32>,
    %c0_15 = arith.constant 0 : index
    %c32 = arith.constant 32 : index
    %15 = vector.load %arg7[%c0_15, %c32] : memref<44x72xf32, #tpu.memory_space<vmem>>, vector<11x8xf32>
    tpu.vector_store %arg7[%c0_15, %c32], %12 {strides = array<i32>} : memref<44x72xf32, #tpu.memory_space<vmem>>, vector<11x8xf32>,
    %16 = vector.extract_strided_slice %10 {offsets = [1, 0], sizes = [11, 8], strides = [1, 1]} : vector<12x8xf32> to vector<11x8xf32>
    %c0_16 = arith.constant 0 : index
    %c40 = arith.constant 40 : index
    %17 = vector.load %arg7[%c0_16, %c40] : memref<44x72xf32, #tpu.memory_space<vmem>>, vector<11x8xf32>
    tpu.vector_store %arg7[%c0_16, %c40], %16 {strides = array<i32>} : memref<44x72xf32, #tpu.memory_space<vmem>>, vector<11x8xf32>,
    %c2 = arith.constant 2 : index
    %c0_17 = arith.constant 0 : index
    %c0_18 = arith.constant 0 : index
    %18 = vector.load %arg0[%c2, %c0_17, %c0_18] : memref<10x12x8xf32, #tpu.memory_space<vmem>>, vector<1x12x8xf32>
    %19 = vector.shape_cast %18 : vector<1x12x8xf32> to vector<12x8xf32>
    %c2_19 = arith.constant 2 : index
    %c0_20 = arith.constant 0 : index
    %c0_21 = arith.constant 0 : index
    %20 = vector.load %arg1[%c2_19, %c0_20, %c0_21] : memref<10x11x8xf32, #tpu.memory_space<vmem>>, vector<1x11x8xf32>
    %21 = vector.shape_cast %20 : vector<1x11x8xf32> to vector<11x8xf32>
    %22 = vector.extract_strided_slice %19 {offsets = [0, 0], sizes = [11, 8], strides = [1, 1]} : vector<12x8xf32> to vector<11x8xf32>
    %c0_22 = arith.constant 0 : index
    %c48 = arith.constant 48 : index
    %23 = vector.load %arg7[%c0_22, %c48] : memref<44x72xf32, #tpu.memory_space<vmem>>, vector<11x8xf32>
    tpu.vector_store %arg7[%c0_22, %c48], %22 {strides = array<i32>} : memref<44x72xf32, #tpu.memory_space<vmem>>, vector<11x8xf32>,
    %c0_23 = arith.constant 0 : index
    %c56 = arith.constant 56 : index
    %24 = vector.load %arg7[%c0_23, %c56] : memref<44x72xf32, #tpu.memory_space<vmem>>, vector<11x8xf32>
    tpu.vector_store %arg7[%c0_23, %c56], %21 {strides = array<i32>} : memref<44x72xf32, #tpu.memory_space<vmem>>, vector<11x8xf32>,
    %25 = vector.extract_strided_slice %19 {offsets = [1, 0], sizes = [11, 8], strides = [1, 1]} : vector<12x8xf32> to vector<11x8xf32>
    %c0_24 = arith.constant 0 : index
    %c64 = arith.constant 64 : index
    %26 = vector.load %arg7[%c0_24, %c64] : memref<44x72xf32, #tpu.memory_space<vmem>>, vector<11x8xf32>
    tpu.vector_store %arg7[%c0_24, %c64], %25 {strides = array<i32>} : memref<44x72xf32, #tpu.memory_space<vmem>>, vector<11x8xf32>,
    %c2_25 = arith.constant 2 : index
    %c0_26 = arith.constant 0 : index
    %c0_27 = arith.constant 0 : index
    %27 = vector.load %arg0[%c2_25, %c0_26, %c0_27] : memref<10x12x8xf32, #tpu.memory_space<vmem>>, vector<1x12x8xf32>
    %28 = vector.shape_cast %27 : vector<1x12x8xf32> to vector<12x8xf32>
    %c2_28 = arith.constant 2 : index
    %c0_29 = arith.constant 0 : index
    %c0_30 = arith.constant 0 : index
    %29 = vector.load %arg1[%c2_28, %c0_29, %c0_30] : memref<10x11x8xf32, #tpu.memory_space<vmem>>, vector<1x11x8xf32>
    %30 = vector.shape_cast %29 : vector<1x11x8xf32> to vector<11x8xf32>
    %31 = vector.extract_strided_slice %28 {offsets = [0, 0], sizes = [11, 8], strides = [1, 1]} : vector<12x8xf32> to vector<11x8xf32>
    %c11 = arith.constant 11 : index
    %c0_31 = arith.constant 0 : index
    %32 = vector.load %arg7[%c11, %c0_31] : memref<44x72xf32, #tpu.memory_space<vmem>>, vector<11x8xf32>
    tpu.vector_store %arg7[%c11, %c0_31], %31 {strides = array<i32>} : memref<44x72xf32, #tpu.memory_space<vmem>>, vector<11x8xf32>,
    %c11_32 = arith.constant 11 : index
    %c8_33 = arith.constant 8 : index
    %33 = vector.load %arg7[%c11_32, %c8_33] : memref<44x72xf32, #tpu.memory_space<vmem>>, vector<11x8xf32>
    tpu.vector_store %arg7[%c11_32, %c8_33], %30 {strides = array<i32>} : memref<44x72xf32, #tpu.memory_space<vmem>>, vector<11x8xf32>,
    %34 = vector.extract_strided_slice %28 {offsets = [1, 0], sizes = [11, 8], strides = [1, 1]} : vector<12x8xf32> to vector<11x8xf32>
    %c11_34 = arith.constant 11 : index
    %c16_35 = arith.constant 16 : index
    %35 = vector.load %arg7[%c11_34, %c16_35] : memref<44x72xf32, #tpu.memory_space<vmem>>, vector<11x8xf32>
    tpu.vector_store %arg7[%c11_34, %c16_35], %34 {strides = array<i32>} : memref<44x72xf32, #tpu.memory_space<vmem>>, vector<11x8xf32>,
    %c3 = arith.constant 3 : index
    %c0_36 = arith.constant 0 : index
    %c0_37 = arith.constant 0 : index
    %36 = vector.load %arg0[%c3, %c0_36, %c0_37] : memref<10x12x8xf32, #tpu.memory_space<vmem>>, vector<1x12x8xf32>
    %37 = vector.shape_cast %36 : vector<1x12x8xf32> to vector<12x8xf32>
    %c3_38 = arith.constant 3 : index
    %c0_39 = arith.constant 0 : index
    %c0_40 = arith.constant 0 : index
    %38 = vector.load %arg1[%c3_38, %c0_39, %c0_40] : memref<10x11x8xf32, #tpu.memory_space<vmem>>, vector<1x11x8xf32>
    %39 = vector.shape_cast %38 : vector<1x11x8xf32> to vector<11x8xf32>
    %40 = vector.extract_strided_slice %37 {offsets = [0, 0], sizes = [11, 8], strides = [1, 1]} : vector<12x8xf32> to vector<11x8xf32>
    %c11_41 = arith.constant 11 : index
    %c24_42 = arith.constant 24 : index
    %41 = vector.load %arg7[%c11_41, %c24_42] : memref<44x72xf32, #tpu.memory_space<vmem>>, vector<11x8xf32>
    tpu.vector_store %arg7[%c11_41, %c24_42], %40 {strides = array<i32>} : memref<44x72xf32, #tpu.memory_space<vmem>>, vector<11x8xf32>,
    %c11_43 = arith.constant 11 : index
    %c32_44 = arith.constant 32 : index
    %42 = vector.load %arg7[%c11_43, %c32_44] : memref<44x72xf32, #tpu.memory_space<vmem>>, vector<11x8xf32>
    tpu.vector_store %arg7[%c11_43, %c32_44], %39 {strides = array<i32>} : memref<44x72xf32, #tpu.memory_space<vmem>>, vector<11x8xf32>,
    %43 = vector.extract_strided_slice %37 {offsets = [1, 0], sizes = [11, 8], strides = [1, 1]} : vector<12x8xf32> to vector<11x8xf32>
    %c11_45 = arith.constant 11 : index
    %c40_46 = arith.constant 40 : index
    %44 = vector.load %arg7[%c11_45, %c40_46] : memref<44x72xf32, #tpu.memory_space<vmem>>, vector<11x8xf32>
    tpu.vector_store %arg7[%c11_45, %c40_46], %43 {strides = array<i32>} : memref<44x72xf32, #tpu.memory_space<vmem>>, vector<11x8xf32>,
    %c4 = arith.constant 4 : index
    %c0_47 = arith.constant 0 : index
    %c0_48 = arith.constant 0 : index
    %45 = vector.load %arg0[%c4, %c0_47, %c0_48] : memref<10x12x8xf32, #tpu.memory_space<vmem>>, vector<1x12x8xf32>
    %46 = vector.shape_cast %45 : vector<1x12x8xf32> to vector<12x8xf32>
    %c4_49 = arith.constant 4 : index
    %c0_50 = arith.constant 0 : index
    %c0_51 = arith.constant 0 : index
    %47 = vector.load %arg1[%c4_49, %c0_50, %c0_51] : memref<10x11x8xf32, #tpu.memory_space<vmem>>, vector<1x11x8xf32>
    %48 = vector.shape_cast %47 : vector<1x11x8xf32> to vector<11x8xf32>
    %49 = vector.extract_strided_slice %46 {offsets = [0, 0], sizes = [11, 8], strides = [1, 1]} : vector<12x8xf32> to vector<11x8xf32>
    %c11_52 = arith.constant 11 : index
    %c48_53 = arith.constant 48 : index
    %50 = vector.load %arg7[%c11_52, %c48_53] : memref<44x72xf32, #tpu.memory_space<vmem>>, vector<11x8xf32>
    tpu.vector_store %arg7[%c11_52, %c48_53], %49 {strides = array<i32>} : memref<44x72xf32, #tpu.memory_space<vmem>>, vector<11x8xf32>,
    %c11_54 = arith.constant 11 : index
    %c56_55 = arith.constant 56 : index
    %51 = vector.load %arg7[%c11_54, %c56_55] : memref<44x72xf32, #tpu.memory_space<vmem>>, vector<11x8xf32>
    tpu.vector_store %arg7[%c11_54, %c56_55], %48 {strides = array<i32>} : memref<44x72xf32, #tpu.memory_space<vmem>>, vector<11x8xf32>,
    %52 = vector.extract_strided_slice %46 {offsets = [1, 0], sizes = [11, 8], strides = [1, 1]} : vector<12x8xf32> to vector<11x8xf32>
    %c11_56 = arith.constant 11 : index
    %c64_57 = arith.constant 64 : index
    %53 = vector.load %arg7[%c11_56, %c64_57] : memref<44x72xf32, #tpu.memory_space<vmem>>, vector<11x8xf32>
    tpu.vector_store %arg7[%c11_56, %c64_57], %52 {strides = array<i32>} : memref<44x72xf32, #tpu.memory_space<vmem>>, vector<11x8xf32>,
    %c5 = arith.constant 5 : index
    %c0_58 = arith.constant 0 : index
    %c0_59 = arith.constant 0 : index
    %54 = vector.load %arg0[%c5, %c0_58, %c0_59] : memref<10x12x8xf32, #tpu.memory_space<vmem>>, vector<1x12x8xf32>
    %55 = vector.shape_cast %54 : vector<1x12x8xf32> to vector<12x8xf32>
    %c5_60 = arith.constant 5 : index
    %c0_61 = arith.constant 0 : index
    %c0_62 = arith.constant 0 : index
    %56 = vector.load %arg1[%c5_60, %c0_61, %c0_62] : memref<10x11x8xf32, #tpu.memory_space<vmem>>, vector<1x11x8xf32>
    %57 = vector.shape_cast %56 : vector<1x11x8xf32> to vector<11x8xf32>
    %58 = vector.extract_strided_slice %55 {offsets = [0, 0], sizes = [11, 8], strides = [1, 1]} : vector<12x8xf32> to vector<11x8xf32>
    %c22 = arith.constant 22 : index
    %c0_63 = arith.constant 0 : index
    %59 = vector.load %arg7[%c22, %c0_63] : memref<44x72xf32, #tpu.memory_space<vmem>>, vector<11x8xf32>
    tpu.vector_store %arg7[%c22, %c0_63], %58 {strides = array<i32>} : memref<44x72xf32, #tpu.memory_space<vmem>>, vector<11x8xf32>,
    %c22_64 = arith.constant 22 : index
    %c8_65 = arith.constant 8 : index
    %60 = vector.load %arg7[%c22_64, %c8_65] : memref<44x72xf32, #tpu.memory_space<vmem>>, vector<11x8xf32>
    tpu.vector_store %arg7[%c22_64, %c8_65], %57 {strides = array<i32>} : memref<44x72xf32, #tpu.memory_space<vmem>>, vector<11x8xf32>,
    %61 = vector.extract_strided_slice %55 {offsets = [1, 0], sizes = [11, 8], strides = [1, 1]} : vector<12x8xf32> to vector<11x8xf32>
    %c22_66 = arith.constant 22 : index
    %c16_67 = arith.constant 16 : index
    %62 = vector.load %arg7[%c22_66, %c16_67] : memref<44x72xf32, #tpu.memory_space<vmem>>, vector<11x8xf32>
    tpu.vector_store %arg7[%c22_66, %c16_67], %61 {strides = array<i32>} : memref<44x72xf32, #tpu.memory_space<vmem>>, vector<11x8xf32>,
    %c6 = arith.constant 6 : index
    %c0_68 = arith.constant 0 : index
    %c0_69 = arith.constant 0 : index
    %63 = vector.load %arg0[%c6, %c0_68, %c0_69] : memref<10x12x8xf32, #tpu.memory_space<vmem>>, vector<1x12x8xf32>
    %64 = vector.shape_cast %63 : vector<1x12x8xf32> to vector<12x8xf32>
    %c6_70 = arith.constant 6 : index
    %c0_71 = arith.constant 0 : index
    %c0_72 = arith.constant 0 : index
    %65 = vector.load %arg1[%c6_70, %c0_71, %c0_72] : memref<10x11x8xf32, #tpu.memory_space<vmem>>, vector<1x11x8xf32>
    %66 = vector.shape_cast %65 : vector<1x11x8xf32> to vector<11x8xf32>
    %67 = vector.extract_strided_slice %64 {offsets = [0, 0], sizes = [11, 8], strides = [1, 1]} : vector<12x8xf32> to vector<11x8xf32>
    %c22_73 = arith.constant 22 : index
    %c24_74 = arith.constant 24 : index
    %68 = vector.load %arg7[%c22_73, %c24_74] : memref<44x72xf32, #tpu.memory_space<vmem>>, vector<11x8xf32>
    tpu.vector_store %arg7[%c22_73, %c24_74], %67 {strides = array<i32>} : memref<44x72xf32, #tpu.memory_space<vmem>>, vector<11x8xf32>,
    %c22_75 = arith.constant 22 : index
    %c32_76 = arith.constant 32 : index
    %69 = vector.load %arg7[%c22_75, %c32_76] : memref<44x72xf32, #tpu.memory_space<vmem>>, vector<11x8xf32>
    tpu.vector_store %arg7[%c22_75, %c32_76], %66 {strides = array<i32>} : memref<44x72xf32, #tpu.memory_space<vmem>>, vector<11x8xf32>,
    %70 = vector.extract_strided_slice %64 {offsets = [1, 0], sizes = [11, 8], strides = [1, 1]} : vector<12x8xf32> to vector<11x8xf32>
    %c22_77 = arith.constant 22 : index
    %c40_78 = arith.constant 40 : index
    %71 = vector.load %arg7[%c22_77, %c40_78] : memref<44x72xf32, #tpu.memory_space<vmem>>, vector<11x8xf32>
    tpu.vector_store %arg7[%c22_77, %c40_78], %70 {strides = array<i32>} : memref<44x72xf32, #tpu.memory_space<vmem>>, vector<11x8xf32>,
    %c7 = arith.constant 7 : index
    %c0_79 = arith.constant 0 : index
    %c0_80 = arith.constant 0 : index
    %72 = vector.load %arg0[%c7, %c0_79, %c0_80] : memref<10x12x8xf32, #tpu.memory_space<vmem>>, vector<1x12x8xf32>
    %73 = vector.shape_cast %72 : vector<1x12x8xf32> to vector<12x8xf32>
    %c7_81 = arith.constant 7 : index
    %c0_82 = arith.constant 0 : index
    %c0_83 = arith.constant 0 : index
    %74 = vector.load %arg1[%c7_81, %c0_82, %c0_83] : memref<10x11x8xf32, #tpu.memory_space<vmem>>, vector<1x11x8xf32>
    %75 = vector.shape_cast %74 : vector<1x11x8xf32> to vector<11x8xf32>
    %76 = vector.extract_strided_slice %73 {offsets = [0, 0], sizes = [11, 8], strides = [1, 1]} : vector<12x8xf32> to vector<11x8xf32>
    %c22_84 = arith.constant 22 : index
    %c48_85 = arith.constant 48 : index
    %77 = vector.load %arg7[%c22_84, %c48_85] : memref<44x72xf32, #tpu.memory_space<vmem>>, vector<11x8xf32>
    tpu.vector_store %arg7[%c22_84, %c48_85], %76 {strides = array<i32>} : memref<44x72xf32, #tpu.memory_space<vmem>>, vector<11x8xf32>,
    %c22_86 = arith.constant 22 : index
    %c56_87 = arith.constant 56 : index
    %78 = vector.load %arg7[%c22_86, %c56_87] : memref<44x72xf32, #tpu.memory_space<vmem>>, vector<11x8xf32>
    tpu.vector_store %arg7[%c22_86, %c56_87], %75 {strides = array<i32>} : memref<44x72xf32, #tpu.memory_space<vmem>>, vector<11x8xf32>,
    %79 = vector.extract_strided_slice %73 {offsets = [1, 0], sizes = [11, 8], strides = [1, 1]} : vector<12x8xf32> to vector<11x8xf32>
    %c22_88 = arith.constant 22 : index
    %c64_89 = arith.constant 64 : index
    %80 = vector.load %arg7[%c22_88, %c64_89] : memref<44x72xf32, #tpu.memory_space<vmem>>, vector<11x8xf32>
    tpu.vector_store %arg7[%c22_88, %c64_89], %79 {strides = array<i32>} : memref<44x72xf32, #tpu.memory_space<vmem>>, vector<11x8xf32>,
    %c7_90 = arith.constant 7 : index
    %c0_91 = arith.constant 0 : index
    %c0_92 = arith.constant 0 : index
    %81 = vector.load %arg0[%c7_90, %c0_91, %c0_92] : memref<10x12x8xf32, #tpu.memory_space<vmem>>, vector<1x12x8xf32>
    %82 = vector.shape_cast %81 : vector<1x12x8xf32> to vector<12x8xf32>
    %c7_93 = arith.constant 7 : index
    %c0_94 = arith.constant 0 : index
    %c0_95 = arith.constant 0 : index
    %83 = vector.load %arg1[%c7_93, %c0_94, %c0_95] : memref<10x11x8xf32, #tpu.memory_space<vmem>>, vector<1x11x8xf32>
    %84 = vector.shape_cast %83 : vector<1x11x8xf32> to vector<11x8xf32>
    %85 = vector.extract_strided_slice %82 {offsets = [0, 0], sizes = [11, 8], strides = [1, 1]} : vector<12x8xf32> to vector<11x8xf32>
    %c33 = arith.constant 33 : index
    %c0_96 = arith.constant 0 : index
    %86 = vector.load %arg7[%c33, %c0_96] : memref<44x72xf32, #tpu.memory_space<vmem>>, vector<11x8xf32>
    tpu.vector_store %arg7[%c33, %c0_96], %85 {strides = array<i32>} : memref<44x72xf32, #tpu.memory_space<vmem>>, vector<11x8xf32>,
    %c33_97 = arith.constant 33 : index
    %c8_98 = arith.constant 8 : index
    %87 = vector.load %arg7[%c33_97, %c8_98] : memref<44x72xf32, #tpu.memory_space<vmem>>, vector<11x8xf32>
    tpu.vector_store %arg7[%c33_97, %c8_98], %84 {strides = array<i32>} : memref<44x72xf32, #tpu.memory_space<vmem>>, vector<11x8xf32>,
    %88 = vector.extract_strided_slice %82 {offsets = [1, 0], sizes = [11, 8], strides = [1, 1]} : vector<12x8xf32> to vector<11x8xf32>
    %c33_99 = arith.constant 33 : index
    %c16_100 = arith.constant 16 : index
    %89 = vector.load %arg7[%c33_99, %c16_100] : memref<44x72xf32, #tpu.memory_space<vmem>>, vector<11x8xf32>
    tpu.vector_store %arg7[%c33_99, %c16_100], %88 {strides = array<i32>} : memref<44x72xf32, #tpu.memory_space<vmem>>, vector<11x8xf32>,
    %c8_101 = arith.constant 8 : index
    %c0_102 = arith.constant 0 : index
    %c0_103 = arith.constant 0 : index
    %90 = vector.load %arg0[%c8_101, %c0_102, %c0_103] : memref<10x12x8xf32, #tpu.memory_space<vmem>>, vector<1x12x8xf32>
    %91 = vector.shape_cast %90 : vector<1x12x8xf32> to vector<12x8xf32>
    %c8_104 = arith.constant 8 : index
    %c0_105 = arith.constant 0 : index
    %c0_106 = arith.constant 0 : index
    %92 = vector.load %arg1[%c8_104, %c0_105, %c0_106] : memref<10x11x8xf32, #tpu.memory_space<vmem>>, vector<1x11x8xf32>
    %93 = vector.shape_cast %92 : vector<1x11x8xf32> to vector<11x8xf32>
    %94 = vector.extract_strided_slice %91 {offsets = [0, 0], sizes = [11, 8], strides = [1, 1]} : vector<12x8xf32> to vector<11x8xf32>
    %c33_107 = arith.constant 33 : index
    %c24_108 = arith.constant 24 : index
    %95 = vector.load %arg7[%c33_107, %c24_108] : memref<44x72xf32, #tpu.memory_space<vmem>>, vector<11x8xf32>
    tpu.vector_store %arg7[%c33_107, %c24_108], %94 {strides = array<i32>} : memref<44x72xf32, #tpu.memory_space<vmem>>, vector<11x8xf32>,
    %c33_109 = arith.constant 33 : index
    %c32_110 = arith.constant 32 : index
    %96 = vector.load %arg7[%c33_109, %c32_110] : memref<44x72xf32, #tpu.memory_space<vmem>>, vector<11x8xf32>
    tpu.vector_store %arg7[%c33_109, %c32_110], %93 {strides = array<i32>} : memref<44x72xf32, #tpu.memory_space<vmem>>, vector<11x8xf32>,
    %97 = vector.extract_strided_slice %91 {offsets = [1, 0], sizes = [11, 8], strides = [1, 1]} : vector<12x8xf32> to vector<11x8xf32>
    %c33_111 = arith.constant 33 : index
    %c40_112 = arith.constant 40 : index
    %98 = vector.load %arg7[%c33_111, %c40_112] : memref<44x72xf32, #tpu.memory_space<vmem>>, vector<11x8xf32>
    tpu.vector_store %arg7[%c33_111, %c40_112], %97 {strides = array<i32>} : memref<44x72xf32, #tpu.memory_space<vmem>>, vector<11x8xf32>,
    %c9 = arith.constant 9 : index
    %c0_113 = arith.constant 0 : index
    %c0_114 = arith.constant 0 : index
    %99 = vector.load %arg0[%c9, %c0_113, %c0_114] : memref<10x12x8xf32, #tpu.memory_space<vmem>>, vector<1x12x8xf32>
    %100 = vector.shape_cast %99 : vector<1x12x8xf32> to vector<12x8xf32>
    %c9_115 = arith.constant 9 : index
    %c0_116 = arith.constant 0 : index
    %c0_117 = arith.constant 0 : index
    %101 = vector.load %arg1[%c9_115, %c0_116, %c0_117] : memref<10x11x8xf32, #tpu.memory_space<vmem>>, vector<1x11x8xf32>
    %102 = vector.shape_cast %101 : vector<1x11x8xf32> to vector<11x8xf32>
    %103 = vector.extract_strided_slice %100 {offsets = [0, 0], sizes = [11, 8], strides = [1, 1]} : vector<12x8xf32> to vector<11x8xf32>
    %c33_118 = arith.constant 33 : index
    %c48_119 = arith.constant 48 : index
    %104 = vector.load %arg7[%c33_118, %c48_119] : memref<44x72xf32, #tpu.memory_space<vmem>>, vector<11x8xf32>
    tpu.vector_store %arg7[%c33_118, %c48_119], %103 {strides = array<i32>} : memref<44x72xf32, #tpu.memory_space<vmem>>, vector<11x8xf32>,
    %c33_120 = arith.constant 33 : index
    %c56_121 = arith.constant 56 : index
    %105 = vector.load %arg7[%c33_120, %c56_121] : memref<44x72xf32, #tpu.memory_space<vmem>>, vector<11x8xf32>
    tpu.vector_store %arg7[%c33_120, %c56_121], %102 {strides = array<i32>} : memref<44x72xf32, #tpu.memory_space<vmem>>, vector<11x8xf32>,
    %106 = vector.extract_strided_slice %100 {offsets = [1, 0], sizes = [11, 8], strides = [1, 1]} : vector<12x8xf32> to vector<11x8xf32>
    %c33_122 = arith.constant 33 : index
    %c64_123 = arith.constant 64 : index
    %107 = vector.load %arg7[%c33_122, %c64_123] : memref<44x72xf32, #tpu.memory_space<vmem>>, vector<11x8xf32>
    tpu.vector_store %arg7[%c33_122, %c64_123], %106 {strides = array<i32>} : memref<44x72xf32, #tpu.memory_space<vmem>>, vector<11x8xf32>,
    %c0_124 = arith.constant 0 : index
    %c0_125 = arith.constant 0 : index
    %108 = vector.load %arg7[%c0_124, %c0_125] : memref<44x72xf32, #tpu.memory_space<vmem>>, vector<44x72xf32>
    %c0_126 = arith.constant 0 : index
    %c0_127 = arith.constant 0 : index
    %109 = vector.load %arg2[%c0_126, %c0_127] : memref<72x16xf32, #tpu.memory_space<vmem>>, vector<72x16xf32>
    %cst = arith.constant dense<0.000000e+00> : vector<44x16xf32>
    %110 = tpu.matmul %108, %109, %cst {dimension_numbers = #tpu.dot_dimension_numbers<[1], [0], [0], [1], [0, 0, 1, 1], [], []>} : vector<44x72xf32>, vector<72x16xf32>, vector<44x16xf32> -> vector<44x16xf32>
    %c0_128 = arith.constant 0 : index
    %c0_129 = arith.constant 0 : index
    %111 = vector.load %arg3[%c0_128, %c0_129] : memref<1x16xf32, #tpu.memory_space<vmem>>, vector<1x16xf32>
    %112 = vector.broadcast %111 : vector<1x16xf32> to vector<44x16xf32>
    %113 = arith.addf %110, %112 : vector<44x16xf32>
    %cst_130 = arith.constant 0.000000e+00 : f32
    %114 = vector.broadcast %cst_130 : f32 to vector<44x16xf32>
    %115 = arith.maximumf %113, %114 : vector<44x16xf32>
    %c0_131 = arith.constant 0 : index
    %c0_132 = arith.constant 0 : index
    %116 = vector.load %arg8[%c0_131, %c0_132] : memref<44x16xf32, #tpu.memory_space<vmem>>, vector<44x16xf32>
    tpu.vector_store %arg8[%c0_131, %c0_132], %115 {strides = array<i32>} : memref<44x16xf32, #tpu.memory_space<vmem>>, vector<44x16xf32>,
    %c0_133 = arith.constant 0 : index
    %c0_134 = arith.constant 0 : index
    %117 = vector.load %arg8[%c0_133, %c0_134] : memref<44x16xf32, #tpu.memory_space<vmem>>, vector<22x16xf32>
    %c0_135 = arith.constant 0 : index
    %c0_136 = arith.constant 0 : index
    %c0_137 = arith.constant 0 : index
    %118 = vector.load %arg4[%c0_135, %c0_136, %c0_137] : memref<3x22x16xf32, #tpu.memory_space<vmem>>, vector<1x22x16xf32>
    %119 = vector.shape_cast %118 : vector<1x22x16xf32> to vector<22x16xf32>
    %120 = arith.mulf %117, %119 : vector<22x16xf32>
    %cst_138 = arith.constant dense<0.000000e+00> : vector<22xf32>
    %121 = vector.multi_reduction <add>, %120, %cst_138 [1] : vector<22x16xf32> to vector<22xf32>
    %122 = vector.shape_cast %121 : vector<22xf32> to vector<22x1xf32>
    %cst_139 = arith.constant dense<0.000000e+00> : vector<1xf32>
    %123 = vector.multi_reduction <add>, %122, %cst_139 [0] : vector<22x1xf32> to vector<1xf32>
    %124 = vector.shape_cast %123 : vector<1xf32> to vector<1x1xf32>
    %c0_140 = arith.constant 0 : index
    %c0_141 = arith.constant 0 : index
    %125 = vector.load %arg5[%c0_140, %c0_141] : memref<1x3xf32, #tpu.memory_space<vmem>>, vector<1x1xf32>
    %126 = arith.addf %124, %125 : vector<1x1xf32>
    %c0_142 = arith.constant 0 : index
    %c0_143 = arith.constant 0 : index
    %127 = vector.load %arg6[%c0_142, %c0_143] : memref<2x3xf32, #tpu.memory_space<vmem>>, vector<1x1xf32>
    tpu.vector_store %arg6[%c0_142, %c0_143], %126 {strides = array<i32>} : memref<2x3xf32, #tpu.memory_space<vmem>>, vector<1x1xf32>,
    %c1_144 = arith.constant 1 : index
    %c0_145 = arith.constant 0 : index
    %c0_146 = arith.constant 0 : index
    %128 = vector.load %arg4[%c1_144, %c0_145, %c0_146] : memref<3x22x16xf32, #tpu.memory_space<vmem>>, vector<1x22x16xf32>
    %129 = vector.shape_cast %128 : vector<1x22x16xf32> to vector<22x16xf32>
    %130 = arith.mulf %117, %129 : vector<22x16xf32>
    %cst_147 = arith.constant dense<0.000000e+00> : vector<22xf32>
    %131 = vector.multi_reduction <add>, %130, %cst_147 [1] : vector<22x16xf32> to vector<22xf32>
    %132 = vector.shape_cast %131 : vector<22xf32> to vector<22x1xf32>
    %cst_148 = arith.constant dense<0.000000e+00> : vector<1xf32>
    %133 = vector.multi_reduction <add>, %132, %cst_148 [0] : vector<22x1xf32> to vector<1xf32>
    %134 = vector.shape_cast %133 : vector<1xf32> to vector<1x1xf32>
    %c0_149 = arith.constant 0 : index
    %c1_150 = arith.constant 1 : index
    %135 = vector.load %arg5[%c0_149, %c1_150] : memref<1x3xf32, #tpu.memory_space<vmem>>, vector<1x1xf32>
    %136 = arith.addf %134, %135 : vector<1x1xf32>
    %c0_151 = arith.constant 0 : index
    %c1_152 = arith.constant 1 : index
    %137 = vector.load %arg6[%c0_151, %c1_152] : memref<2x3xf32, #tpu.memory_space<vmem>>, vector<1x1xf32>
    tpu.vector_store %arg6[%c0_151, %c1_152], %136 {strides = array<i32>} : memref<2x3xf32, #tpu.memory_space<vmem>>, vector<1x1xf32>,
    %c2_153 = arith.constant 2 : index
    %c0_154 = arith.constant 0 : index
    %c0_155 = arith.constant 0 : index
    %138 = vector.load %arg4[%c2_153, %c0_154, %c0_155] : memref<3x22x16xf32, #tpu.memory_space<vmem>>, vector<1x22x16xf32>
    %139 = vector.shape_cast %138 : vector<1x22x16xf32> to vector<22x16xf32>
    %140 = arith.mulf %117, %139 : vector<22x16xf32>
    %cst_156 = arith.constant dense<0.000000e+00> : vector<22xf32>
    %141 = vector.multi_reduction <add>, %140, %cst_156 [1] : vector<22x16xf32> to vector<22xf32>
    %142 = vector.shape_cast %141 : vector<22xf32> to vector<22x1xf32>
    %cst_157 = arith.constant dense<0.000000e+00> : vector<1xf32>
    %143 = vector.multi_reduction <add>, %142, %cst_157 [0] : vector<22x1xf32> to vector<1xf32>
    %144 = vector.shape_cast %143 : vector<1xf32> to vector<1x1xf32>
    %c0_158 = arith.constant 0 : index
    %c2_159 = arith.constant 2 : index
    %145 = vector.load %arg5[%c0_158, %c2_159] : memref<1x3xf32, #tpu.memory_space<vmem>>, vector<1x1xf32>
    %146 = arith.addf %144, %145 : vector<1x1xf32>
    %c0_160 = arith.constant 0 : index
    %c2_161 = arith.constant 2 : index
    %147 = vector.load %arg6[%c0_160, %c2_161] : memref<2x3xf32, #tpu.memory_space<vmem>>, vector<1x1xf32>
    tpu.vector_store %arg6[%c0_160, %c2_161], %146 {strides = array<i32>} : memref<2x3xf32, #tpu.memory_space<vmem>>, vector<1x1xf32>,
    %c22_162 = arith.constant 22 : index
    %c0_163 = arith.constant 0 : index
    %148 = vector.load %arg8[%c22_162, %c0_163] : memref<44x16xf32, #tpu.memory_space<vmem>>, vector<22x16xf32>
    %c0_164 = arith.constant 0 : index
    %c0_165 = arith.constant 0 : index
    %c0_166 = arith.constant 0 : index
    %149 = vector.load %arg4[%c0_164, %c0_165, %c0_166] : memref<3x22x16xf32, #tpu.memory_space<vmem>>, vector<1x22x16xf32>
    %150 = vector.shape_cast %149 : vector<1x22x16xf32> to vector<22x16xf32>
    %151 = arith.mulf %148, %150 : vector<22x16xf32>
    %cst_167 = arith.constant dense<0.000000e+00> : vector<22xf32>
    %152 = vector.multi_reduction <add>, %151, %cst_167 [1] : vector<22x16xf32> to vector<22xf32>
    %153 = vector.shape_cast %152 : vector<22xf32> to vector<22x1xf32>
    %cst_168 = arith.constant dense<0.000000e+00> : vector<1xf32>
    %154 = vector.multi_reduction <add>, %153, %cst_168 [0] : vector<22x1xf32> to vector<1xf32>
    %155 = vector.shape_cast %154 : vector<1xf32> to vector<1x1xf32>
    %c0_169 = arith.constant 0 : index
    %c0_170 = arith.constant 0 : index
    %156 = vector.load %arg5[%c0_169, %c0_170] : memref<1x3xf32, #tpu.memory_space<vmem>>, vector<1x1xf32>
    %157 = arith.addf %155, %156 : vector<1x1xf32>
    %c1_171 = arith.constant 1 : index
    %c0_172 = arith.constant 0 : index
    %158 = vector.load %arg6[%c1_171, %c0_172] : memref<2x3xf32, #tpu.memory_space<vmem>>, vector<1x1xf32>
    tpu.vector_store %arg6[%c1_171, %c0_172], %157 {strides = array<i32>} : memref<2x3xf32, #tpu.memory_space<vmem>>, vector<1x1xf32>,
    %c1_173 = arith.constant 1 : index
    %c0_174 = arith.constant 0 : index
    %c0_175 = arith.constant 0 : index
    %159 = vector.load %arg4[%c1_173, %c0_174, %c0_175] : memref<3x22x16xf32, #tpu.memory_space<vmem>>, vector<1x22x16xf32>
    %160 = vector.shape_cast %159 : vector<1x22x16xf32> to vector<22x16xf32>
    %161 = arith.mulf %148, %160 : vector<22x16xf32>
    %cst_176 = arith.constant dense<0.000000e+00> : vector<22xf32>
    %162 = vector.multi_reduction <add>, %161, %cst_176 [1] : vector<22x16xf32> to vector<22xf32>
    %163 = vector.shape_cast %162 : vector<22xf32> to vector<22x1xf32>
    %cst_177 = arith.constant dense<0.000000e+00> : vector<1xf32>
    %164 = vector.multi_reduction <add>, %163, %cst_177 [0] : vector<22x1xf32> to vector<1xf32>
    %165 = vector.shape_cast %164 : vector<1xf32> to vector<1x1xf32>
    %c0_178 = arith.constant 0 : index
    %c1_179 = arith.constant 1 : index
    %166 = vector.load %arg5[%c0_178, %c1_179] : memref<1x3xf32, #tpu.memory_space<vmem>>, vector<1x1xf32>
    %167 = arith.addf %165, %166 : vector<1x1xf32>
    %c1_180 = arith.constant 1 : index
    %c1_181 = arith.constant 1 : index
    %168 = vector.load %arg6[%c1_180, %c1_181] : memref<2x3xf32, #tpu.memory_space<vmem>>, vector<1x1xf32>
    tpu.vector_store %arg6[%c1_180, %c1_181], %167 {strides = array<i32>} : memref<2x3xf32, #tpu.memory_space<vmem>>, vector<1x1xf32>,
    %c2_182 = arith.constant 2 : index
    %c0_183 = arith.constant 0 : index
    %c0_184 = arith.constant 0 : index
    %169 = vector.load %arg4[%c2_182, %c0_183, %c0_184] : memref<3x22x16xf32, #tpu.memory_space<vmem>>, vector<1x22x16xf32>
    %170 = vector.shape_cast %169 : vector<1x22x16xf32> to vector<22x16xf32>
    %171 = arith.mulf %148, %170 : vector<22x16xf32>
    %cst_185 = arith.constant dense<0.000000e+00> : vector<22xf32>
    %172 = vector.multi_reduction <add>, %171, %cst_185 [1] : vector<22x16xf32> to vector<22xf32>
    %173 = vector.shape_cast %172 : vector<22xf32> to vector<22x1xf32>
    %cst_186 = arith.constant dense<0.000000e+00> : vector<1xf32>
    %174 = vector.multi_reduction <add>, %173, %cst_186 [0] : vector<22x1xf32> to vector<1xf32>
    %175 = vector.shape_cast %174 : vector<1xf32> to vector<1x1xf32>
    %c0_187 = arith.constant 0 : index
    %c2_188 = arith.constant 2 : index
    %176 = vector.load %arg5[%c0_187, %c2_188] : memref<1x3xf32, #tpu.memory_space<vmem>>, vector<1x1xf32>
    %177 = arith.addf %175, %176 : vector<1x1xf32>
    %c1_189 = arith.constant 1 : index
    %c2_190 = arith.constant 2 : index
    %178 = vector.load %arg6[%c1_189, %c2_190] : memref<2x3xf32, #tpu.memory_space<vmem>>, vector<1x1xf32>
    tpu.vector_store %arg6[%c1_189, %c2_190], %177 {strides = array<i32>} : memref<2x3xf32, #tpu.memory_space<vmem>>, vector<1x1xf32>,
    return
  }
}

</mosaic_0001>

<bundles_post_ra>
// kernel: server_conv2d_forward.1
= control target key start
LH: loop header
LB: loop body
LE: loop exit
PB: predicated region body
PF: predicated region fallthrough
CT: control target
= control target key end

     0   :  { %s923_s27 = smov 8   ;;  %vm30_vm0 = vcmask 59392   ;;  %vm28_vm1 = vcmask 64512   ;;  %s924_s20 = smov 16   ;;  %s1386_s0 = inlined_call_operand.vmem [shape: f32[10,12,8], index: 0, kind: input, shape index: {}]   ;;  %s1387_s1 = inlined_call_operand.vmem [shape: f32[10,11,8], index: 1, kind: input, shape index: {}]   ;;  %s1388_s2 = inlined_call_operand.vmem [shape: f32[72,16], index: 2, kind: input, shape index: {}]   ;;  %s1389_s3 = inlined_call_operand.vmem [shape: f32[1,16], index: 3, kind: input, shape index: {}]   ;;  %s1390_s4 = inlined_call_operand.vmem [shape: f32[3,22,16], index: 4, kind: input, shape index: {}]   ;;  %s1391_s5 = inlined_call_operand.vmem [shape: f32[1,3], index: 5, kind: input, shape index: {}]   ;;  %s1392_s6 = inlined_call_operand.hbm [shape: f32[2,3], index: 6, kind: output, shape index: {}]  }
   0x1   :  { %v781_v0 = vld [vmem:[%s1387_s1 + $0x50] sm:$0xff]  ;;  %v973_v1 = vld [vmem:[%s1387_s1 + $0x20] sm:$0xff]  ;;  %v782_v2 = vld [vmem:[%s1387_s1 + $0x58] sm:$0x7] }
   0x2   :  { %240 = vrot.lane.b32.xlu1 %v781_v0, %s923_s27  ;;  %144 = vrot.lane.b32.xlu0 %v973_v1, %s923_s27  ;;  %v770_v3 = vld [vmem:[%s1387_s1 + $0x28] sm:$0x7]  ;;  %v991_v5 = vld [vmem:[%s1386_s0 + $0x20] sm:$0xff] }
   0x3   :  { %v768_v4 = vld [vmem:[%s1386_s0 + $0x28] sm:$0xf]  ;;  %v780_v6 = vld [vmem:[%s1386_s0 + $0x58] sm:$0xf]  ;;  %v779_v7 = vld [vmem:[%s1386_s0 + $0x50] sm:$0xff]  ;;  %140 = vst.msk [vmem:[#allocation2 + $0xb] sm:$0xff] %vm28_vm1, %v991_v5 }
   0x4   :  { %141 = vst.msk [vmem:[#allocation2 + $0x13] sm:$0x7] %vm30_vm0, %v768_v4  ;;  %237 = vst.msk [vmem:[#allocation2 + $0x1e] sm:$0x7] %vm30_vm0, %v780_v6  ;;  %v25_v8 = vld [vmem:[%s1386_s0 + $0x8] sm:$0xf] }
   0x5   :  { %236 = vst.msk [vmem:[#allocation2 + $0x16] sm:$0xff] %vm28_vm1, %v779_v7  ;;  %v24_v9 = vld [vmem:[%s1386_s0] sm:$0xff]  ;;  %v1016_v10 = vld [vmem:[%s1386_s0 + $0x70] sm:$0xff]  ;;  %v792_v11 = vld [vmem:[%s1386_s0 + $0x78] sm:$0xf] }
   0x6   :  { %242 = vrot.lane.b32.xlu1 %v782_v2, %s923_s27  ;;  %146 = vrot.lane.b32.xlu0 %v770_v3, %s923_s27  ;;  %31 = vst.msk [vmem:[#allocation2 + $0x8] sm:$0x7] %vm30_vm0, %v25_v8  ;;  %331 = vst.msk [vmem:[#allocation2 + $0x29] sm:$0x7] %vm30_vm0, %v792_v11  ;;  %v772_v12 = vld [vmem:[%s1386_s0 + $0x38] sm:$0xf] }
   0x7   :  { %29 = vst.msk [vmem:[#allocation2] sm:$0xff] %vm28_vm1, %v24_v9  ;;  %330 = vst.msk [vmem:[#allocation2 + $0x21] sm:$0xff] %vm28_vm1, %v1016_v10  ;;  %v771_v13 = vld [vmem:[%s1386_s0 + $0x30] sm:$0xff] }
   0xa   :  { %156 = vrot.lane.b32.xlu1 %v768_v4, %s924_s20  ;;  %154 = vrot.lane.b32.xlu0 %v991_v5, %s924_s20 }
   0xe   :  { %252 = vrot.lane.b32.xlu1 %v780_v6, %s924_s20  ;;  %250 = vrot.lane.b32.xlu0 %v779_v7, %s924_s20 }
   0xf   :  { %11 = vsyncpa [#allocation5], 0  ;;  %s925_s28 = smov 24   ;;  %v784_v14 = vld [vmem:[%s1386_s0 + $0x68] sm:$0xf]  ;;  %v783_v15 = vld [vmem:[%s1386_s0 + $0x60] sm:$0xff] }
  0x10   :  { %v774_v16 = vld [vmem:[%s1387_s1 + $0x38] sm:$0x7]  ;;  %v773_v17 = vld [vmem:[%s1387_s1 + $0x30] sm:$0xff]  ;;  %s926_s13 = smov 32   ;;  %v786_v18 = vld [vmem:[%s1387_s1 + $0x68] sm:$0x7] }
  0x11   :  { %v785_v19 = vld [vmem:[%s1387_s1 + $0x60] sm:$0xff]  ;;  %v27_v20 = vld [vmem:[%s1387_s1 + $0x8] sm:$0x7]  ;;  %s927_s23 = smov 40   ;;  %v794_v22 = vld [vmem:[%s1387_s1 + $0x78] sm:$0x7] }
  0x12   :  { %172 = vrot.lane.b32.xlu1 %v772_v12, %s925_s28  ;;  %170 = vrot.lane.b32.xlu0 %v771_v13, %s925_s28  ;;  %v26_v21 = vld [vmem:[%s1387_s1] sm:$0xff]  ;;  %v793_v23 = vld [vmem:[%s1387_s1 + $0x70] sm:$0xff]  ;;  %s928_s10 = smov 48   ;;  %s929_s17 = smov 56   ;;  %vm40_vm2 = vcmask 130112   ;;  %vm42_vm3 = vcmask 124992  }
  0x13   :  { %v776_v24 = vld [vmem:[%s1386_s0 + $0x48] sm:$0xf]  ;;  %v775_v25 = vld [vmem:[%s1386_s0 + $0x40] sm:$0xff]  ;;  %v759_v26 = vld [vmem:[%s1386_s0 + $0x10] sm:$0xff]  ;;  %s930_s24 = smov 64   ;;  %vm54_vm4 = vcmask 191616  }
  0x14   :  { %v777_v27 = vld [vmem:[%s1387_s1 + $0x40] sm:$0xff]  ;;  %v760_v28 = vld [vmem:[%s1386_s0 + $0x18] sm:$0xf]  ;;  %v778_v30 = vld [vmem:[%s1387_s1 + $0x48] sm:$0x7]  ;;  %vm52_vm5 = vcmask 195713  }
  0x15   :  { %v788_v29 = vld [vmem:[%s1386_s0 + $0x78] sm:$0xf]  ;;  %v795_v31 = vld [vmem:[%s1386_s0 + $0x80] sm:$0xff]  ;;  %v427_v33 = vld [vmem:[%s1388_s2 + $0x8] sm:$0xff]  ;;  %vm72_vm6 = vcmask 256192   ;;  %vm70_vm7 = vcmask 261312  }
  0x16   :  { %268 = vrot.lane.b32.xlu1 %v784_v14, %s925_s28  ;;  %266 = vrot.lane.b32.xlu0 %v783_v15, %s925_s28  ;;  %v426_v32 = vld [vmem:[%s1388_s2] sm:$0xff]  ;;  %v761_v35 = vld [vmem:[%s1387_s1 + $0x10] sm:$0xff]  ;;  %vm84_vm8 = vcmask 321792   ;;  %vm82_vm9 = vcmask 326912   ;;  %vm94_vm10 = vcmask 388416   ;;  %vm92_vm11 = vcmask 392513  }
  0x17   :  { %v864_v34 = vpack.c.bf16 %v427_v33, %v426_v32  ;;  %v796_v36 = vld [vmem:[%s1386_s0 + $0x88] sm:$0xf]  ;;  %v428_v37 = vld [vmem:[%s1388_s2 + $0x10] sm:$0xff]  ;;  %v429_v38 = vld [vmem:[%s1388_s2 + $0x18] sm:$0xff]  ;;  %vm112_vm12 = vcmask 452992   ;;  %vm110_vm13 = vcmask 458112  }
  0x18   :  { %v868_v39 = vpack.c.bf16 %v429_v38, %v428_v37  ;;  %v762_v40 = vld [vmem:[%s1387_s1 + $0x18] sm:$0x7]  ;;  %v430_v41 = vld [vmem:[%s1388_s2 + $0x20] sm:$0xff]  ;;  %v431_v42 = vld [vmem:[%s1388_s2 + $0x28] sm:$0xff]  ;;  %vm122_vm14 = vcmask 523712   ;;  %vm124_vm15 = vcmask 518592  }
  0x19   :  { %880 = vmatprep.subr.bf16.mxu1 %v864_v34  ;;  %865 = vmatprep.subr.bf16.mxu0 %v864_v34  ;;  %v872_v43 = vpack.c.bf16 %v431_v42, %v430_v41  ;;  %v790_v44 = vld [vmem:[%s1387_s1 + $0x78] sm:$0x7]  ;;  %v432_v45 = vld [vmem:[%s1388_s2 + $0x30] sm:$0xff]  ;;  %v797_v48 = vld [vmem:[%s1387_s1 + $0x80] sm:$0xff]  ;;  %vm132_vm0 = vcmask 589313   ;;  %vm134_vm1 = vcmask 585216  }
  0x1a   :  { %182 = vrot.lane.b32.xlu1 %v774_v16, %s926_s13  ;;  %180 = vrot.lane.b32.xlu0 %v773_v17, %s926_s13  ;;  %v433_v46 = vld [vmem:[%s1388_s2 + $0x38] sm:$0xff]  ;;  %v434_v49 = vld [vmem:[%s1388_s2 + $0x40] sm:$0xff]  ;;  %s931_s7 = smov [#allocation4]  }
  0x1b   :  { %885 = vmatpush3.bf16.msra.mxu1 %v864_v34  ;;  %867 = vmatpush3.bf16.msra.mxu0 %v864_v34  ;;  %v876_v47 = vpack.c.bf16 %v433_v46, %v432_v45  ;;  %v798_v50 = vld [vmem:[%s1387_s1 + $0x88] sm:$0x7]  ;;  %v799_v52 = vld [vmem:[%s1386_s0 + $0x90] sm:$0xff]  ;;  %v800_v54 = vld [vmem:[%s1386_s0 + $0x98] sm:$0xf]  ;;  %s751_s8 = sshll.u32 %s931_s7, 4  ;;  %s752_s8 = int_to_ptr.vmem [resolvable:$true] %s751_s8 }
  0x1c   :  { %881 = vmatprep.subr.bf16.mxu1 %v868_v39  ;;  %869 = vmatprep.subr.bf16.mxu0 %v868_v39  ;;  %v764_v51 = vld [vmem:[%s1386_s0 + $0x28] sm:$0xf]  ;;  %v801_v55 = vld [vmem:[%s1387_s1 + $0x90] sm:$0xff]  ;;  %v802_v58 = vld [vmem:[%s1387_s1 + $0x98] sm:$0x7]  ;;  %s899_s9 = scalar_lea.vmem %s752_s8, 32  ;;  %p904_p1 = scmp.lt.s32.totalorder %s752_s8, %s752_s8 }
  0x1d   :  { %v766_v53 = vld [vmem:[%s1387_s1 + $0x28] sm:$0x7]  ;;  %p900_p0 = scmp.ne.s32.totalorder %s752_s8, %s899_s9  ;;  %p905_p2 = scmp.lt.s32.totalorder %s899_s9, %s899_s9 }
  0x1e   :  { %278 = vrot.lane.b32.xlu1 %v786_v18, %s926_s13  ;;  %276 = vrot.lane.b32.xlu0 %v785_v19, %s926_s13 }
  0x1f   :  { %886 = vmatpush3.bf16.msra.mxu1 %v868_v39  ;;  %871 = vmatpush3.bf16.msra.mxu0 %v868_v39  ;;  %p906_p3 = por %p905_p2, %p904_p1 }
  0x20   :  { %882 = vmatprep.subr.bf16.mxu1 %v872_v43  ;;  %873 = vmatprep.subr.bf16.mxu0 %v872_v43 }
  0x21   :  { %p907_p4 = pnand %p906_p3, %p900_p0 }
  0x22   :  { %36 = vrot.lane.b32.xlu1 %v27_v20, %s923_s27  ;;  %34 = vrot.lane.b32.xlu0 %v26_v21, %s923_s27 }
  0x23   :  { %887 = vmatpush3.bf16.msra.mxu1 %v872_v43  ;;  %875 = vmatpush3.bf16.msra.mxu0 %v872_v43 }
  0x24   :  { %883 = vmatprep.subr.bf16.mxu1 %v876_v47  ;;  %877 = vmatprep.subr.bf16.mxu0 %v876_v47 }
  0x26   :  { %190 = vrot.lane.b32.xlu1 %v772_v12, %s927_s23  ;;  %188 = vrot.lane.b32.xlu0 %v771_v13, %s927_s23 }
  0x27   :  { %888 = vmatpush3.bf16.msra.mxu1 %v876_v47  ;;  %879 = vmatpush3.bf16.msra.mxu0 %v876_v47 }
  0x28   :  { %884 = vmatprep.subr.mxu1 %v434_v49  ;;  %853 = vmatprep.subr.mxu0 %v434_v49 }
  0x2a   :  { %286 = vrot.lane.b32.xlu1 %v784_v14, %s927_s23  ;;  %284 = vrot.lane.b32.xlu0 %v783_v15, %s927_s23 }
  0x2b   :  { %889 = vmatpush3.msra.mxu1 %v434_v49  ;;  %854 = vmatpush3.msra.mxu0 %v434_v49 }
  0x2e   :  { %336 = vrot.lane.b32.xlu1 %v794_v22, %s923_s27  ;;  %334 = vrot.lane.b32.xlu0 %v793_v23, %s923_s27 }
  0x32   :  { %48 = vrot.lane.b32.xlu1 %v25_v8, %s924_s20  ;;  %46 = vrot.lane.b32.xlu0 %v24_v9, %s924_s20 }
  0x36   :  { %206 = vrot.lane.b32.xlu1 %v776_v24, %s928_s10  ;;  %204 = vrot.lane.b32.xlu0 %v775_v25, %s928_s10 }
  0x3a   :  { %344 = vrot.lane.b32.xlu1 %v1016_v10, %s924_s20  ;;  %300 = vrot.lane.b32.xlu0 %v1016_v10, %s928_s10 }
  0x3e   :  { %64 = vrot.lane.b32.xlu1 %v759_v26, %s925_s28  ;;  %346 = vrot.lane.b32.xlu0 %v792_v11, %s924_s20 }
  0x42   :  { %214 = vrot.lane.b32.xlu1 %v777_v27, %s929_s17  ;;  %66 = vrot.lane.b32.xlu0 %v760_v28, %s925_s28 }
  0x46   :  { %302 = vrot.lane.b32.xlu1 %v788_v29, %s928_s10  ;;  %216 = vrot.lane.b32.xlu0 %v778_v30, %s929_s17 }
  0x4a   :  { %360 = vrot.lane.b32.xlu1 %v795_v31, %s925_s28  ;;  %310 = vrot.lane.b32.xlu0 %v793_v23, %s929_s17 }
  0x4e   :  { %76 = vrot.lane.b32.xlu1 %v761_v35, %s926_s13  ;;  %362 = vrot.lane.b32.xlu0 %v796_v36, %s925_s28 }
  0x52   :  { %222 = vrot.lane.b32.xlu1 %v775_v25, %s930_s24  ;;  %78 = vrot.lane.b32.xlu0 %v762_v40, %s926_s13 }
  0x56   :  { %312 = vrot.lane.b32.xlu1 %v790_v44, %s929_s17  ;;  %224 = vrot.lane.b32.xlu0 %v776_v24, %s930_s24 }
  0x5a   :  { %370 = vrot.lane.b32.xlu1 %v797_v48, %s926_s13  ;;  %318 = vrot.lane.b32.xlu0 %v1016_v10, %s930_s24 }
  0x5e   :  { %86 = vrot.lane.b32.xlu1 %v759_v26, %s927_s23  ;;  %372 = vrot.lane.b32.xlu0 %v798_v50, %s926_s13 }
  0x62   :  { %320 = vrot.lane.b32.xlu1 %v788_v29, %s930_s24  ;;  %88 = vrot.lane.b32.xlu0 %v760_v28, %s927_s23 }
  0x66   :  { %378 = vrot.lane.b32.xlu0 %v795_v31, %s927_s23  ;;  %380 = vrot.lane.b32.xlu1 %v796_v36, %s927_s23 }
  0x6a   :  { %104 = vrot.lane.b32.xlu0 %v991_v5, %s928_s10  ;;  %106 = vrot.lane.b32.xlu1 %v764_v51, %s928_s10 }
  0x6e   :  { %394 = vrot.lane.b32.xlu0 %v799_v52, %s928_s10  ;;  %116 = vrot.lane.b32.xlu1 %v973_v1, %s929_s17 }
  0x72   :  { %118 = vrot.lane.b32.xlu0 %v766_v53, %s929_s17  ;;  %396 = vrot.lane.b32.xlu1 %v800_v54, %s928_s10 }
  0x74   :  { %v241_v56 = vpop.permute.xlu1 %240  ;;  %v145_v57 = vpop.permute.xlu0 %144 }
  0x75   :  { %246 = vst.msk [vmem:[#allocation2 + $0x16] sm:$0xff] %vm40_vm2, %v241_v56  ;;  %150 = vst.msk [vmem:[#allocation2 + $0xb] sm:$0xff] %vm40_vm2, %v145_v57 }
  0x76   :  { %404 = vrot.lane.b32.xlu0 %v801_v55, %s929_s17  ;;  %126 = vrot.lane.b32.xlu1 %v991_v5, %s930_s24 }
  0x78   :  { %v243_v59 = vpop.permute.xlu1 %242  ;;  %v147_v60 = vpop.permute.xlu0 %146 }
  0x79   :  { %247 = vst.msk [vmem:[#allocation2 + $0x1e] sm:$0x7] %vm42_vm3, %v243_v59  ;;  %151 = vst.msk [vmem:[#allocation2 + $0x13] sm:$0x7] %vm42_vm3, %v147_v60 }
  0x7a   :  { %128 = vrot.lane.b32.xlu0 %v764_v51, %s930_s24  ;;  %406 = vrot.lane.b32.xlu1 %v802_v58, %s929_s17 }
  0x7c   :  { %v157_v61 = vpop.permute.xlu1 %156  ;;  %v155_v62 = vpop.permute.xlu0 %154 }
  0x7d   :  { %161 = vst.msk [vmem:[#allocation2 + $0x12] sm:$0xf] %vm54_vm4, %v157_v61 }
  0x7e   :  { %160 = vst.msk [vmem:[#allocation2 + $0xa] sm:$0xfe] %vm52_vm5, %v155_v62  ;;  %412 = vrot.lane.b32.xlu0 %v799_v52, %s930_s24  ;;  %414 = vrot.lane.b32.xlu1 %v800_v54, %s930_s24 }
  0x80   :  { %v253_v63 = vpop.permute.xlu1 %252  ;;  %v251_v0 = vpop.permute.xlu0 %250 }
  0x81   :  { %257 = vst.msk [vmem:[#allocation2 + $0x1d] sm:$0xf] %vm54_vm4, %v253_v63  ;;  %v803_v63 = vld [vmem:[%s1389_s3] ss:$0 sm:$0xff] }
  0x82   :  { %256 = vst.msk [vmem:[#allocation2 + $0x15] sm:$0xfe] %vm52_vm5, %v251_v0 }
  0x84   :  { %v173_v1 = vpop.permute.xlu1 %172  ;;  %v171_v2 = vpop.permute.xlu0 %170 }
  0x85   :  { %177 = vst.msk [vmem:[#allocation2 + $0x13] sm:$0x7] %vm72_vm6, %v173_v1 }
  0x86   :  { %176 = vst.msk [vmem:[#allocation2 + $0xb] sm:$0xff] %vm70_vm7, %v171_v2 }
  0x88   :  { %v269_v3 = vpop.permute.xlu1 %268  ;;  %v267_v4 = vpop.permute.xlu0 %266 }
  0x89   :  { %273 = vst.msk [vmem:[#allocation2 + $0x1e] sm:$0x7] %vm72_vm6, %v269_v3 }
  0x8a   :  { %272 = vst.msk [vmem:[#allocation2 + $0x16] sm:$0xff] %vm70_vm7, %v267_v4 }
  0x8c   :  { %v183_v5 = vpop.permute.xlu1 %182  ;;  %v181_v6 = vpop.permute.xlu0 %180 }
  0x8d   :  { %187 = vst.msk [vmem:[#allocation2 + $0x13] sm:$0x7] %vm84_vm8, %v183_v5 }
  0x8e   :  { %186 = vst.msk [vmem:[#allocation2 + $0xb] sm:$0xff] %vm82_vm9, %v181_v6 }
  0x90   :  { %v279_v7 = vpop.permute.xlu1 %278  ;;  %v277_v8 = vpop.permute.xlu0 %276 }
  0x91   :  { %283 = vst.msk [vmem:[#allocation2 + $0x1e] sm:$0x7] %vm84_vm8, %v279_v7 }
  0x92   :  { %282 = vst.msk [vmem:[#allocation2 + $0x16] sm:$0xff] %vm82_vm9, %v277_v8 }
  0x94   :  { %v37_v9 = vpop.permute.xlu1 %36  ;;  %v35_v10 = vpop.permute.xlu0 %34 }
  0x95   :  { %43 = vst.msk [vmem:[#allocation2 + $0x8] sm:$0x7] %vm42_vm3, %v37_v9 }
  0x96   :  { %41 = vst.msk [vmem:[#allocation2] sm:$0xff] %vm40_vm2, %v35_v10 }
  0x98   :  { %v191_v11 = vpop.permute.xlu1 %190  ;;  %v189_v12 = vpop.permute.xlu0 %188 }
  0x99   :  { %195 = vst.msk [vmem:[#allocation2 + $0x12] sm:$0xf] %vm94_vm10, %v191_v11 }
  0x9a   :  { %194 = vst.msk [vmem:[#allocation2 + $0xa] sm:$0xfe] %vm92_vm11, %v189_v12 }
  0x9c   :  { %v287_v13 = vpop.permute.xlu1 %286  ;;  %v285_v14 = vpop.permute.xlu0 %284 }
  0x9d   :  { %291 = vst.msk [vmem:[#allocation2 + $0x1d] sm:$0xf] %vm94_vm10, %v287_v13 }
  0x9e   :  { %290 = vst.msk [vmem:[#allocation2 + $0x15] sm:$0xfe] %vm92_vm11, %v285_v14 }
  0xa0   :  { %v337_v15 = vpop.permute.xlu1 %336  ;;  %v335_v16 = vpop.permute.xlu0 %334 }
  0xa1   :  { %341 = vst.msk [vmem:[#allocation2 + $0x29] sm:$0x7] %vm42_vm3, %v337_v15  ;;  %vm562_vm3 = vcmask 130048  }
  0xa2   :  { %340 = vst.msk [vmem:[#allocation2 + $0x21] sm:$0xff] %vm40_vm2, %v335_v16  ;;  %vm442_vm2 = vcmask 588800  }
  0xa4   :  { %v49_v17 = vpop.permute.xlu1 %48  ;;  %v47_v18 = vpop.permute.xlu0 %46 }
  0xa5   :  { %55 = vst.msk [vmem:[#allocation2 + $0x7] sm:$0xf] %vm54_vm4, %v49_v17 }
  0xa6   :  { %53 = vst.msk [vmem:[#allocation2 - $0x1] sm:$0xfe] %vm52_vm5, %v47_v18  ;;  %v574_v18 = vld [vmem:[%s1390_s4 + $0x8] sm:$0xff] }
  0xa8   :  { %v207_v19 = vpop.permute.xlu1 %206  ;;  %v205_v20 = vpop.permute.xlu0 %204 }
  0xa9   :  { %211 = vst.msk [vmem:[#allocation2 + $0x13] sm:$0x7] %vm112_vm12, %v207_v19 }
  0xaa   :  { %210 = vst.msk [vmem:[#allocation2 + $0xb] sm:$0xff] %vm110_vm13, %v205_v20  ;;  %v811_v20 = vld [vmem:[%s1390_s4 + $0x20] sm:$0xff] }
  0xac   :  { %v345_v21 = vpop.permute.xlu1 %344  ;;  %v301_v22 = vpop.permute.xlu0 %300 }
  0xad   :  { %350 = vst.msk [vmem:[#allocation2 + $0x20] sm:$0xfe] %vm52_vm5, %v345_v21  ;;  %vm585_vm5 = vcmask 128000  }
  0xae   :  { %306 = vst.msk [vmem:[#allocation2 + $0x16] sm:$0xff] %vm110_vm13, %v301_v22 }
  0xb0   :  { %v65_v23 = vpop.permute.xlu1 %64  ;;  %v347_v24 = vpop.permute.xlu0 %346 }
  0xb1   :  { %71 = vst.msk [vmem:[#allocation2] sm:$0xff] %vm70_vm7, %v65_v23  ;;  %v573_v23 = vld [vmem:[%s1390_s4] sm:$0xff] }
  0xb2   :  { %351 = vst.msk [vmem:[#allocation2 + $0x28] sm:$0xf] %vm54_vm4, %v347_v24  ;;  %vm568_vm4 = vcmask 125952  }
  0xb4   :  { %v215_v25 = vpop.permute.xlu1 %214  ;;  %v67_v26 = vpop.permute.xlu0 %66 }
  0xb5   :  { %220 = vst.msk [vmem:[#allocation2 + $0xb] sm:$0xff] %vm122_vm14, %v215_v25 }
  0xb6   :  { %73 = vst.msk [vmem:[#allocation2 + $0x8] sm:$0x7] %vm72_vm6, %v67_v26 }
  0xb8   :  { %v303_v27 = vpop.permute.xlu1 %302  ;;  %v217_v28 = vpop.permute.xlu0 %216 }
  0xb9   :  { %307 = vst.msk [vmem:[#allocation2 + $0x1e] sm:$0x7] %vm112_vm12, %v303_v27 }
  0xba   :  { %221 = vst.msk [vmem:[#allocation2 + $0x13] sm:$0x7] %vm124_vm15, %v217_v28 }
  0xbc   :  { %v361_v29 = vpop.permute.xlu1 %360  ;;  %v311_v30 = vpop.permute.xlu0 %310 }
  0xbd   :  { %366 = vst.msk [vmem:[#allocation2 + $0x21] sm:$0xff] %vm70_vm7, %v361_v29  ;;  %vm601_vm7 = vcmask 0  }
  0xbe   :  { %316 = vst.msk [vmem:[#allocation2 + $0x16] sm:$0xff] %vm122_vm14, %v311_v30  ;;  %v814_v30 = vld [vmem:[%s1390_s4 + $0x38] sm:$0xff] }
  0xc0   :  { %v77_v31 = vpop.permute.xlu1 %76  ;;  %v363_v32 = vpop.permute.xlu0 %362 }
  0xc1   :  { %83 = vst.msk [vmem:[#allocation2] sm:$0xff] %vm82_vm9, %v77_v31 }
  0xc2   :  { %367 = vst.msk [vmem:[#allocation2 + $0x29] sm:$0x7] %vm72_vm6, %v363_v32  ;;  %vm590_vm6 = vcmask 1045504  }
  0xc4   :  { %v223_v33 = vpop.permute.xlu1 %222  ;;  %v79_v34 = vpop.permute.xlu0 %78 }
  0xc5   :  { %228 = vst.msk [vmem:[#allocation2 + $0xa] sm:$0xfe] %vm132_vm0, %v223_v33  ;;  %v810_v33 = vld [vmem:[%s1390_s4 + $0x18] sm:$0xff] }
  0xc6   :  { %85 = vst.msk [vmem:[#allocation2 + $0x8] sm:$0x7] %vm84_vm8, %v79_v34 }
  0xc8   :  { %v313_v35 = vpop.permute.xlu1 %312  ;;  %v225_v36 = vpop.permute.xlu0 %224 }
  0xc9   :  { %317 = vst.msk [vmem:[#allocation2 + $0x1e] sm:$0x7] %vm124_vm15, %v313_v35 }
  0xca   :  { %229 = vst.msk [vmem:[#allocation2 + $0x12] sm:$0xf] %vm134_vm1, %v225_v36 }
  0xcc   :  { %v371_v37 = vpop.permute.xlu1 %370  ;;  %v319_v38 = vpop.permute.xlu0 %318 }
  0xcd   :  { %376 = vst.msk [vmem:[#allocation2 + $0x21] sm:$0xff] %vm82_vm9, %v371_v37  ;;  %v575_v37 = vld [vmem:[%s1390_s4 + $0x10] sm:$0x3f]  ;;  %vm659_vm9 = vcmask 16400  }
  0xce   :  { %324 = vst.msk [vmem:[#allocation2 + $0x15] sm:$0xfe] %vm132_vm0, %v319_v38 }
  0xd0   :  { %v87_v39 = vpop.permute.xlu1 %86  ;;  %v373_v40 = vpop.permute.xlu0 %372 }
  0xd1   :  { %93 = vst.msk [vmem:[#allocation2 - $0x1] sm:$0xfe] %vm92_vm11, %v87_v39 }
  0xd2   :  { %377 = vst.msk [vmem:[#allocation2 + $0x29] sm:$0x7] %vm84_vm8, %v373_v40  ;;  %v813_v40 = vld [vmem:[%s1390_s4 + $0x30] sm:$0xff]  ;;  %vm630_vm8 = vcmask 8200  }
  0xd4   :  { %v321_v41 = vpop.permute.xlu1 %320  ;;  %v89_v42 = vpop.permute.xlu0 %88 }
  0xd5   :  { %v422_v43 = vld [vmem:[#allocation2 + $0x10] sm:$0xff]  ;;  %325 = vst.msk [vmem:[#allocation2 + $0x1d] sm:$0xf] %vm134_vm1, %v321_v41 }
  0xd6   :  { %95 = vst.msk [vmem:[#allocation2 + $0x7] sm:$0xf] %vm94_vm10, %v89_v42  ;;  %858 = vmatprep.mubr.msk.f32.mxu1 %vm442_vm2, %v422_v43 }
  0xd8   :  { %v379_v44 = vpop.permute.xlu0 %378  ;;  %v381_v45 = vpop.permute.xlu1 %380 }
  0xd9   :  { %384 = vst.msk [vmem:[#allocation2 + $0x20] sm:$0xfe] %vm92_vm11, %v379_v44 }
  0xda   :  { %385 = vst.msk [vmem:[#allocation2 + $0x28] sm:$0xf] %vm94_vm10, %v381_v45 }
  0xdc   :  { %v105_v46 = vpop.permute.xlu0 %104  ;;  %v107_v47 = vpop.permute.xlu1 %106  ;;  %v423_v48 = vld [vmem:[#allocation2 + $0x18] sm:$0xff] }
  0xdd   :  { %111 = vst.msk [vmem:[#allocation2] sm:$0xff] %vm110_vm13, %v105_v46  ;;  %859 = vmatmul.mubr.msk.f32.vlgmr.msra.gmra.mrb[0].mxu1 %vm442_vm2, %v423_v48  ;;  %v812_v48 = vld [vmem:[%s1390_s4 + $0x28] sm:$0x3f] }
  0xde   :  { %113 = vst.msk [vmem:[#allocation2 + $0x8] sm:$0x7] %vm112_vm12, %v107_v47 }
  0xe0   :  { %v395_v49 = vpop.permute.xlu0 %394  ;;  %v117_v50 = vpop.permute.xlu1 %116 }
  0xe1   :  { %400 = vst.msk [vmem:[#allocation2 + $0x21] sm:$0xff] %vm110_vm13, %v395_v49 }
  0xe2   :  { %123 = vst.msk [vmem:[#allocation2] sm:$0xff] %vm122_vm14, %v117_v50  ;;  %v666_v50 = vld [vmem:[%s1390_s4 + $0x10] sm:$0x3f] }
  0xe4   :  { %v119_v51 = vpop.permute.xlu0 %118  ;;  %v397_v52 = vpop.permute.xlu1 %396 }
  0xe5   :  { %125 = vst.msk [vmem:[#allocation2 + $0x8] sm:$0x7] %vm124_vm15, %v119_v51 }
  0xe6   :  { %401 = vst.msk [vmem:[#allocation2 + $0x29] sm:$0x7] %vm112_vm12, %v397_v52 }
  0xe8   :  { %v405_v53 = vpop.permute.xlu0 %404  ;;  %v127_v54 = vpop.permute.xlu1 %126 }
  0xe9   :  { %410 = vst.msk [vmem:[#allocation2 + $0x21] sm:$0xff] %vm122_vm14, %v405_v53 }
  0xea   :  { %133 = vst.msk [vmem:[#allocation2 - $0x1] sm:$0xfe] %vm132_vm0, %v127_v54 }
  0xec   :  { %v129_v55 = vpop.permute.xlu0 %128  ;;  %v407_v56 = vpop.permute.xlu1 %406 }
  0xed   :  { %135 = vst.msk [vmem:[#allocation2 + $0x7] sm:$0xf] %vm134_vm1, %v129_v55 }
  0xee   :  { %411 = vst.msk [vmem:[#allocation2 + $0x29] sm:$0x7] %vm124_vm15, %v407_v56 }
  0xf0   :  { %v413_v57 = vpop.permute.xlu0 %412  ;;  %v415_v58 = vpop.permute.xlu1 %414 }
  0xf1   :  { %418 = vst.msk [vmem:[#allocation2 + $0x20] sm:$0xfe] %vm132_vm0, %v413_v57 }
  0xf2   :  { %419 = vst.msk [vmem:[#allocation2 + $0x28] sm:$0xf] %vm134_vm1, %v415_v58 }
  0xf4   :  { %v420_v59 = vld [vmem:[#allocation2] sm:$0xff]  ;;  %v421_v60 = vld [vmem:[#allocation2 + $0x8] sm:$0xff] }
  0xf5   :  { %855 = vmatprep.mubr.msk.f32.mxu0 %vm442_vm2, %v420_v59  ;;  %v815_v59 = vld [vmem:[%s1390_s4 + $0x40] sm:$0x3f] }
  0xf6   :  { %856 = vmatmul.mubr.msk.f32.vlgmr.msra.gmra.mrb[0].mxu0 %vm442_vm2, %v421_v60  ;;  %v818_v60 = vld [vmem:[%s1390_s4 + $0x28] sm:$0x3f] }
  0xf8   :  { %v424_v61 = vld [vmem:[#allocation2 + $0x20] sm:$0xff] }
  0xf9   :  { %v425_v62 = vld [vmem:[#allocation2 + $0x28] sm:$0xf]  ;;  %861 = vmatprep.mubr.msk.f32.mxu1 %vm442_vm2, %v424_v61 }
  0xfa   :  { %862 = vmatmul.mubr.msk.f32.gmra.mrb[2].mxu1 %vm442_vm2, %v425_v62 }
 0x1b0   :  { %v860_v0 = vpop.f32.mrb[0].mxu1 }
 0x1b1   :  { %v543_v1 = vadd.f32 %v860_v0, %v803_v63  ;;  %v537_v2 = vpop.f32.mrb[1].mxu1 }
 0x1b2   :  { %v538_v3 = vadd.f32 %v803_v63, %v537_v2 }
 0x1b3   :  { %v559_v4 = vmax.f32 %v543_v1, 0.0 }
 0x1b4   :  { %v558_v5 = vmax.f32 %v538_v3, 0.0 }
 0x1b5   :  { %566 = vst.msk [vmem:[#allocation3 + $0x18] sm:$0xff] %vm562_vm3, %v559_v4  ;;  %v821_v4 = vld [vmem:[%s1390_s4 + $0x40] sm:$0x3f] }
 0x1b6   :  { %565 = vst.msk [vmem:[#allocation3 + $0x10] sm:$0xff] %vm562_vm3, %v558_v5 }
 0x1bd   :  { %v661_v24 = vld [vmem:[#allocation3 + $0x16] sm:$0xff]  ;;  %v572_v36 = vld [vmem:[#allocation3 + $0x10] sm:$0x3f] }
 0x1be   :  { %v667_v29 = vmul.f32 %v661_v24, %v573_v23  ;;  %v578_v39 = vmul.f32 %v575_v37, %v572_v36  ;;  %v694_v45 = vmul.f32 %v810_v33, %v661_v24  ;;  %v609_v52 = vmul.f32 %v812_v48, %v572_v36 }
 0x1bf   :  { %v721_v56 = vmul.f32 %v813_v40, %v661_v24  ;;  %v638_v62 = vmul.f32 %v815_v59, %v572_v36  ;;  %v599_v36 = vld [vmem:[%s1391_s5] sm:$0x1] }
 0x1c0   :  { %v670_v34 = vsel %vm562_vm3, %v667_v29, 0.0  ;;  %v586_v44 = vsel %vm585_vm5, %v578_v39, 0.0  ;;  %v697_v51 = vsel %vm562_vm3, %v694_v45, 0.0  ;;  %v616_v55 = vsel %vm585_vm5, %v609_v52, 0.0 }
 0x1c1   :  { %v724_v61 = vsel %vm562_vm3, %v721_v56, 0.0  ;;  %v645_v1 = vsel %vm585_vm5, %v638_v62, 0.0  ;;  %v688_v62 = vld [vmem:[%s1391_s5] sm:$0x1] }
 0x1c9   :  { %v857_v6 = vpop.f32.mrb[0].mxu0 }
 0x1ca   :  { %v533_v7 = vadd.f32 %v857_v6, %v803_v63  ;;  %v527_v8 = vpop.f32.mrb[1].mxu0 }
 0x1cb   :  { %v528_v9 = vadd.f32 %v803_v63, %v527_v8 }
 0x1cc   :  { %v557_v10 = vmax.f32 %v533_v7, 0.0 }
 0x1cd   :  { %v556_v11 = vmax.f32 %v528_v9, 0.0  ;;  %v863_v12 = vpop.f32.mrb[2].mxu1 }
 0x1ce   :  { %564 = vst.msk [vmem:[#allocation3 + $0x8] sm:$0xff] %vm562_vm3, %v557_v10  ;;  %v553_v13 = vadd.f32 %v863_v12, %v803_v63  ;;  %v547_v14 = vpop.f32.mrb[3].mxu1 }
 0x1cf   :  { %563 = vst.msk [vmem:[#allocation3] sm:$0xff] %vm562_vm3, %v556_v11  ;;  %v548_v15 = vadd.f32 %v803_v63, %v547_v14 }
 0x1d0   :  { %v561_v16 = vmax.f32 %v553_v13, 0.0 }
 0x1d1   :  { %v560_v17 = vmax.f32 %v548_v15, 0.0 }
 0x1d2   :  { %569 = vst.msk [vmem:[#allocation3 + $0x28] sm:$0xf] %vm568_vm4, %v561_v16 }
 0x1d3   :  { %567 = vst.msk [vmem:[#allocation3 + $0x20] sm:$0xff] %vm562_vm3, %v560_v17 }
 0x1d5   :  { %v571_v19 = vld [vmem:[#allocation3 + $0x8] sm:$0xff] }
 0x1d6   :  { %v577_v21 = vmul.f32 %v574_v18, %v571_v19  ;;  %v570_v22 = vld [vmem:[#allocation3] sm:$0xff]  ;;  %v608_v27 = vmul.f32 %v811_v20, %v571_v19  ;;  %v637_v32 = vmul.f32 %v814_v30, %v571_v19 }
 0x1d7   :  { %v576_v25 = vmul.f32 %v573_v23, %v570_v22  ;;  %v607_v35 = vmul.f32 %v810_v33, %v570_v22  ;;  %v636_v42 = vmul.f32 %v813_v40, %v570_v22 }
 0x1d8   :  { %v582_v26 = vsel %vm562_vm3, %v577_v21, 0.0  ;;  %v613_v31 = vsel %vm562_vm3, %v608_v27, 0.0  ;;  %v642_v38 = vsel %vm562_vm3, %v637_v32, 0.0 }
 0x1d9   :  { %583 = vadd.xlane.f32.xlu1 %v582_v26  ;;  %v579_v28 = vsel %vm562_vm3, %v576_v25, 0.0  ;;  %v610_v41 = vsel %vm562_vm3, %v607_v35, 0.0  ;;  %v639_v46 = vsel %vm562_vm3, %v636_v42, 0.0 }
 0x1da   :  { %580 = vadd.xlane.f32.xlu0 %v579_v28  ;;  %v662_v43 = vld [vmem:[#allocation3 + $0x1e] sm:$0xff]  ;;  %v663_v49 = vld [vmem:[#allocation3 + $0x26] sm:$0x3f] }
 0x1db   :  { %v668_v47 = vmul.f32 %v662_v43, %v574_v18  ;;  %v669_v54 = vmul.f32 %v666_v50, %v663_v49  ;;  %v695_v58 = vmul.f32 %v811_v20, %v662_v43  ;;  %v696_v0 = vmul.f32 %v818_v60, %v663_v49 }
 0x1dc   :  { %v722_v3 = vmul.f32 %v814_v30, %v662_v43  ;;  %v723_v6 = vmul.f32 %v821_v4, %v663_v49 }
 0x1dd   :  { %614 = vadd.xlane.f32.xlu1 %v613_v31  ;;  %v673_v53 = vsel %vm562_vm3, %v668_v47, 0.0  ;;  %v676_v57 = vsel %vm585_vm5, %v669_v54, 0.0  ;;  %v700_v63 = vsel %vm562_vm3, %v695_v58, 0.0  ;;  %v703_v2 = vsel %vm585_vm5, %v696_v0, 0.0 }
 0x1de   :  { %671 = vadd.xlane.f32.xlu0 %v670_v34  ;;  %v727_v5 = vsel %vm562_vm3, %v722_v3, 0.0  ;;  %v730_v7 = vsel %vm585_vm5, %v723_v6, 0.0 }
 0x1e1   :  { %643 = vadd.xlane.f32.xlu1 %v642_v38 }
 0x1e2   :  { %611 = vadd.xlane.f32.xlu0 %v610_v41 }
 0x1e5   :  { %587 = vadd.xlane.f32.xlu1 %v586_v44 }
 0x1e6   :  { %640 = vadd.xlane.f32.xlu0 %v639_v46 }
 0x1e9   :  { %698 = vadd.xlane.f32.xlu1 %v697_v51 }
 0x1ea   :  { %674 = vadd.xlane.f32.xlu0 %v673_v53 }
 0x1ed   :  { %617 = vadd.xlane.f32.xlu1 %v616_v55 }
 0x1ee   :  { %677 = vadd.xlane.f32.xlu0 %v676_v57  ;;  %v628_v57 = vld [vmem:[%s1391_s5] sm:$0x1] }
 0x1f1   :  { %725 = vadd.xlane.f32.xlu1 %v724_v61 }
 0x1f2   :  { %701 = vadd.xlane.f32.xlu0 %v700_v63 }
 0x1f5   :  { %646 = vadd.xlane.f32.xlu1 %v645_v1 }
 0x1f6   :  { %704 = vadd.xlane.f32.xlu0 %v703_v2 }
 0x1fa   :  { %728 = vadd.xlane.f32.xlu0 %v727_v5 }
 0x1fe   :  { %731 = vadd.xlane.f32.xlu0 %v730_v7 }
 0x266   :  { %v584_v8 = vpop.xlane.xlu1 %583 }
 0x267   :  { %v581_v9 = vpop.xlane.xlu0 %580 }
 0x268   :  { %v589_v14 = vadd.f32 %v584_v8, %v581_v9 }
 0x26a   :  { %v615_v10 = vpop.xlane.xlu1 %614 }
 0x26b   :  { %v672_v11 = vpop.xlane.xlu0 %671 }
 0x26e   :  { %v644_v12 = vpop.xlane.xlu1 %643 }
 0x26f   :  { %v612_v13 = vpop.xlane.xlu0 %611 }
 0x270   :  { %v619_v23 = vadd.f32 %v615_v10, %v612_v13 }
 0x272   :  { %v588_v15 = vpop.xlane.xlu1 %587 }
 0x273   :  { %v591_v16 = vsel %vm590_vm6, %v588_v15, 0.0  ;;  %v641_v17 = vpop.xlane.xlu0 %640  ;;  %v657_v15 = vld [vmem:[%s1391_s5] sm:$0x1] }
 0x274   :  { %v592_v18 = vadd.f32 %v591_v16, %v589_v14  ;;  %v648_v43 = vadd.f32 %v644_v12, %v641_v17  ;;  %v715_v17 = vld [vmem:[%s1391_s5] sm:$0x1] }
 0x276   :  { %v593_v19 = vrot.slane %v592_v18, 4  ;;  %v699_v20 = vpop.xlane.xlu1 %698 }
 0x277   :  { %v675_v21 = vpop.xlane.xlu0 %674 }
 0x278   :  { %v594_v22 = vadd.f32 %v593_v19, %v592_v18  ;;  %v679_v26 = vadd.f32 %v675_v21, %v672_v11 }
 0x27a   :  { %v595_v24 = vrot.slane %v594_v22, 2  ;;  %v618_v25 = vpop.xlane.xlu1 %617 }
 0x27b   :  { %v620_v27 = vsel %vm590_vm6, %v618_v25, 0.0  ;;  %v678_v28 = vpop.xlane.xlu0 %677  ;;  %v742_v25 = vld [vmem:[%s1391_s5] sm:$0x1] }
 0x27c   :  { %v596_v29 = vadd.f32 %v595_v24, %v594_v22  ;;  %v621_v30 = vadd.f32 %v620_v27, %v619_v23  ;;  %v680_v31 = vsel %vm590_vm6, %v678_v28, 0.0 }
 0x27d   :  { %v681_v32 = vadd.f32 %v680_v31, %v679_v26 }
 0x27e   :  { %v597_v33 = vrot.slane %v596_v29, 1  ;;  %v622_v34 = vrot.slane %v621_v30, 4  ;;  %v726_v35 = vpop.xlane.xlu1 %725 }
 0x27f   :  { %v682_v37 = vrot.slane %v681_v32, 4  ;;  %v702_v38 = vpop.xlane.xlu0 %701 }
 0x280   :  { %v598_v39 = vadd.f32 %v597_v33, %v596_v29  ;;  %v623_v40 = vadd.f32 %v622_v34, %v621_v30  ;;  %v706_v47 = vadd.f32 %v702_v38, %v699_v20 }
 0x281   :  { %v683_v41 = vadd.f32 %v682_v37, %v681_v32 }
 0x282   :  { %v600_v42 = vadd.f32 %v599_v36, %v598_v39  ;;  %v624_v44 = vrot.slane %v623_v40, 2  ;;  %v647_v45 = vpop.xlane.xlu1 %646 }
 0x283   :  { %v684_v46 = vrot.slane %v683_v41, 2  ;;  %v649_v48 = vsel %vm590_vm6, %v647_v45, 0.0  ;;  %v705_v49 = vpop.xlane.xlu0 %704 }
 0x284   :  { %v625_v50 = vadd.f32 %v624_v44, %v623_v40  ;;  %v650_v51 = vadd.f32 %v649_v48, %v648_v43  ;;  %v707_v52 = vsel %vm590_vm6, %v705_v49, 0.0  ;;  %602 = vst.msk [vmem:[#allocation4] sm:$0x1] %vm601_vm7, %v600_v42 }
 0x285   :  { %v685_v53 = vadd.f32 %v684_v46, %v683_v41  ;;  %v708_v54 = vadd.f32 %v707_v52, %v706_v47 }
 0x286   :  { %v626_v55 = vrot.slane %v625_v50, 1  ;;  %v651_v56 = vrot.slane %v650_v51, 4 }
 0x287   :  { %v686_v58 = vrot.slane %v685_v53, 1  ;;  %v709_v59 = vrot.slane %v708_v54, 4  ;;  %v729_v60 = vpop.xlane.xlu0 %728 }
 0x288   :  { %v627_v61 = vadd.f32 %v626_v55, %v625_v50  ;;  %v652_v63 = vadd.f32 %v651_v56, %v650_v51  ;;  %v733_v6 = vadd.f32 %v729_v60, %v726_v35 }
 0x289   :  { %v687_v0 = vadd.f32 %v686_v58, %v685_v53  ;;  %v710_v1 = vadd.f32 %v709_v59, %v708_v54 }
 0x28a   :  { %v629_v2 = vadd.f32 %v628_v57, %v627_v61  ;;  %v653_v3 = vrot.slane %v652_v63, 2 }
 0x28b   :  { %v689_v4 = vadd.f32 %v688_v62, %v687_v0  ;;  %v711_v5 = vrot.slane %v710_v1, 2  ;;  %v732_v7 = vpop.xlane.xlu0 %731 }
 0x28c   :  { %v654_v8 = vadd.f32 %v653_v3, %v652_v63  ;;  %v734_v9 = vsel %vm590_vm6, %v732_v7, 0.0  ;;  %631 = vst.msk [vmem:[#allocation4] sm:$0x1] %vm630_vm8, %v629_v2 }
 0x28d   :  { %v712_v10 = vadd.f32 %v711_v5, %v710_v1  ;;  %v735_v11 = vadd.f32 %v734_v9, %v733_v6  ;;  %690 = vst.msk [vmem:[#allocation4 + $0x1] sm:$0x1] %vm601_vm7, %v689_v4 }
 0x28e   :  { %v655_v12 = vrot.slane %v654_v8, 1 }
 0x28f   :  { %v713_v13 = vrot.slane %v712_v10, 1  ;;  %v736_v14 = vrot.slane %v735_v11, 4 }
 0x290   :  { %v656_v16 = vadd.f32 %v655_v12, %v654_v8 }
 0x291   :  { %v714_v18 = vadd.f32 %v713_v13, %v712_v10  ;;  %v737_v19 = vadd.f32 %v736_v14, %v735_v11 }
 0x292   :  { %v658_v20 = vadd.f32 %v657_v15, %v656_v16 }
 0x293   :  { %v716_v21 = vadd.f32 %v715_v17, %v714_v18  ;;  %v738_v22 = vrot.slane %v737_v19, 2 }
 0x294   :  { %660 = vst.msk [vmem:[#allocation4] sm:$0x1] %vm659_vm9, %v658_v20 }
 0x295   :  { %v739_v23 = vadd.f32 %v738_v22, %v737_v19  ;;  %717 = vst.msk [vmem:[#allocation4 + $0x1] sm:$0x1] %vm630_vm8, %v716_v21 }
 0x297   :  { %v740_v24 = vrot.slane %v739_v23, 1 }
 0x299   :  { %v741_v26 = vadd.f32 %v740_v24, %v739_v23 }
 0x29b   :  { %v743_v27 = vadd.f32 %v742_v25, %v741_v26 }
 0x29d   :  { %744 = vst.msk [vmem:[#allocation4 + $0x1] sm:$0x1] %vm659_vm9, %v743_v27 }
 0x29e   :  { %910 = shalt.err (!%p907_p4)
}
 0x29f   :  { %s911_s12 = scalar_lea.hbm %s1392_s6, 32 }
 0x2a0   :  { %p912_p5 = scmp.ne.s32.totalorder %s1392_s6, %s911_s12  ;;  %p915_p6 = scmp.lt.u32.totalorder %s911_s12, %s1392_s6 }
 0x2a2   :  { %p917_p7 = pnand %p915_p6, %p912_p5 }
 0x2a4   :  { %920 = shalt.err (!%p917_p7)
}
 0x2a5   :  { %754 = dma.vmem_to_hbm [thread:$0]  %s752_s8, 32, %s1392_s6, [#allocation5]  }
 0x2a6   :  { %921 = dma.done.wait [#allocation5], 32  }
 0x2a7   :  { %922 = vsyncadd [#allocation5], 4294967264 }
 0x2a8   :  { %758 = vsyncpa [#allocation5], 1 }

</bundles_post_ra>
